<compile_context>
chip_gen: v5e
topology: v5e:2x2
jax: 0.10.0
libtpu: 0.0.40
codegen_flags: <defaults>
</compile_context>

<pallas_src>
import math
import functools

import jax
import jax.numpy as jnp
from jax.experimental import pallas as pl
from jax.experimental.pallas import tpu as pltpu  # noqa: F401  (TPU backend)

# ----------------------------- model config ---------------------------------
B = 2            # batch (sentences)
L = 8            # sequence length
H = 32           # hidden size
NH = 2           # attention heads
DH = H // NH     # head dim
I = 64           # FFN intermediate size
NLAYERS = 2
VOCAB = 64
TYPE_VOCAB = 2
LN_EPS = 1e-12   # BERT LayerNorm eps
ATT_SCALE = 1.0 / math.sqrt(DH)

# ------------------- packed small-parameter row layout -----------------------
# One lane-aligned (N_SMALL_ROWS, 128) f32 array; rows sliced statically
# inside the kernel (static ref slices are zero-cost views).
PACK_W = 128
ROW_EMB_G = 0                    # embedding LN gamma        (H)
ROW_EMB_B = 1                    # embedding LN beta         (H)
ROW_POOL_B = 2                   # pooler bias               (H)
ROW_MASK = 3                     # additive mask bias        (B rows of L)
ROW_LAYER0 = ROW_MASK + B
(OFF_BQKV, OFF_BO, OFF_LN1G, OFF_LN1B,
 OFF_B1, OFF_B2, OFF_LN2G, OFF_LN2B) = range(8)
ROWS_PER_LAYER = 8
N_SMALL_ROWS = ROW_LAYER0 + ROWS_PER_LAYER * NLAYERS

# ------------- packed (H, *) weight column layout: [Wqkv | Wo | W1] ----------
W_QKV_END = 3 * H                # 96
W_O_END = W_QKV_END + H          # 128  (Wo slice ends on a 128-lane boundary)
W_1_END = W_O_END + I            # 192


# ----------------------------- in-kernel helpers -----------------------------
def _layernorm(h, g, b):
    mu = jnp.mean(h, axis=-1, keepdims=True)
    d = h - mu
    var = jnp.mean(d * d, axis=-1, keepdims=True)
    return d * jax.lax.rsqrt(var + LN_EPS) * g + b


def _gelu(y):
    # TODO(synk): HF BERT default is exact erf-GELU; tanh approximation used
    # here for robust Mosaic lowering (difference < 1e-3).
    return 0.5 * y * (1.0 + jnp.tanh(0.7978845608028654 *
                                     (y + 0.044715 * y * y * y)))


# ----------------------------- fused forward kernel --------------------------
def sentbert_kernel(emb_ref, small_ref, bighw_ref, w2p_ref, out_ref):
    """Whole SentBert forward on one VMEM-resident (B*L, H) activation slab.

    Operands:
      emb_ref    : (B*L, H)                summed word+pos+type embeddings
      small_ref  : (N_SMALL_ROWS, 128)     packed biases / LN params / mask bias
      bighw_ref  : (NLAYERS, H, 192)       packed [Wqkv | Wo | W1] per layer
      w2p_ref    : (NLAYERS*I + H, H)      stacked W2 per layer + pooler weight
      out_ref    : (B, H)                  pooler output
    """
    def row(r, w):
        # static (1, w) slice of the packed small-parameter array
        return small_ref[r:r + 1, :w]

    # --- embedding LayerNorm ---
    x = _layernorm(emb_ref[...], row(ROW_EMB_G, H), row(ROW_EMB_B, H))   # (B*L, H)
    mask_bias = small_ref[ROW_MASK:ROW_MASK + B, :L]                     # (B, L)
    mask_bias3 = mask_bias[:, None, :]                                   # (B, 1, L)

    for layer in range(NLAYERS):
        base = ROW_LAYER0 + layer * ROWS_PER_LAYER
        w_l = bighw_ref[layer]                         # (H, 192) — one load
        w_qkv = w_l[:, :W_QKV_END]                     # (H, 3H)
        w_o = w_l[:, W_QKV_END:W_O_END]                # (H, H)
        w_1 = w_l[:, W_O_END:W_1_END]                  # (H, I)
        w_2 = w2p_ref[layer * I:(layer + 1) * I, :]    # (I, H)

        # --- fused Q/K/V projection: one (B*L, H) x (H, 3H) matmul ---
        qkv = (jnp.dot(x, w_qkv, preferred_element_type=jnp.float32)
               + row(base + OFF_BQKV, 3 * H))          # (B*L, 3H)

        # --- attention: B-batched einsums, head-concat fused into Wo ---
        attn_res = x + row(base + OFF_BO, H)           # residual + output bias
        for h in range(NH):
            q = qkv[:, h * DH:(h + 1) * DH].reshape(B, L, DH)
            k = qkv[:, H + h * DH:H + (h + 1) * DH].reshape(B, L, DH)
            v = qkv[:, 2 * H + h * DH:2 * H + (h + 1) * DH].reshape(B, L, DH)

            s = (jnp.einsum('bqd,bkd->bqk', q, k,
                            preferred_element_type=jnp.float32) * ATT_SCALE
                 + mask_bias3)                                        # (B, L, L)
            s = s - jnp.max(s, axis=-1, keepdims=True)                # stable softmax
            p = jnp.exp(s)
            p = p * pl.reciprocal(jnp.sum(p, axis=-1, keepdims=True),
                                  approx=False)
            ctx = jnp.einsum('bqk,bkd->bqd', p, v,
                             preferred_element_type=jnp.float32)      # (B, L, DH)
            # fuse head-concat into the output projection: per-head row slice of Wo
            attn_res = attn_res + jnp.dot(
                ctx.reshape(B * L, DH), w_o[h * DH:(h + 1) * DH, :],
                preferred_element_type=jnp.float32)

        x = _layernorm(attn_res, row(base + OFF_LN1G, H), row(base + OFF_LN1B, H))

        # --- feed-forward + residual + LN ---
        inter = _gelu(jnp.dot(x, w_1, preferred_element_type=jnp.float32)
                      + row(base + OFF_B1, I))                        # (B*L, I)
        ffn = (jnp.dot(inter, w_2, preferred_element_type=jnp.float32)
               + row(base + OFF_B2, H) + x)
        x = _layernorm(ffn, row(base + OFF_LN2G, H), row(base + OFF_LN2B, H))

    # --- pooler: gather [CLS] rows first, small matmul, ONE full-block store ---
    pool_w = w2p_ref[NLAYERS * I:, :]                                 # (H, H)
    cls = jnp.concatenate([x[b * L:b * L + 1, :] for b in range(B)], axis=0)
    out_ref[...] = jnp.tanh(jnp.dot(cls, pool_w,
                                    preferred_element_type=jnp.float32)
                            + row(ROW_POOL_B, H))


# ----------------------------- parameters ------------------------------------
def init_params(key):
    def nrm(k, shape, scale=0.02):
        return (scale * jax.random.normal(k, shape)).astype(jnp.float32)

    ks = iter(jax.random.split(key, 8))
    word_emb = nrm(next(ks), (VOCAB, H))
    pos_emb = nrm(next(ks), (L, H))
    type_emb = nrm(next(ks), (TYPE_VOCAB, H))
    wqkv = nrm(next(ks), (NLAYERS, H, 3 * H))      # fused Q/K/V, columns [Q|K|V]
    wo = nrm(next(ks), (NLAYERS, H, H))
    w1 = nrm(next(ks), (NLAYERS, H, I))
    w2 = nrm(next(ks), (NLAYERS, I, H))
    pool_w = nrm(next(ks), (H, H))

    # packed large weights
    big_hw = jnp.concatenate([wqkv, wo, w1], axis=-1)                  # (NL, H, 192)
    w2_pool = jnp.concatenate([w2.reshape(NLAYERS * I, H), pool_w], 0)  # (160, H)

    # packed small parameters (BERT init: gammas = 1, biases = 0)
    def pad_row(v):
        v = jnp.asarray(v, jnp.float32).reshape(-1)
        return jnp.pad(v, (0, PACK_W - v.shape[0]))

    rows = [
        pad_row(jnp.ones(H)),       # emb LN gamma
        pad_row(jnp.zeros(H)),      # emb LN beta
        pad_row(jnp.zeros(H)),      # pooler bias
    ]
    rows += [pad_row(jnp.zeros(L)) for _ in range(B)]   # mask-bias rows (set per call)
    for _ in range(NLAYERS):
        rows += [
            pad_row(jnp.zeros(3 * H)),   # bqkv
            pad_row(jnp.zeros(H)),       # bo
            pad_row(jnp.ones(H)),        # ln1 gamma
            pad_row(jnp.zeros(H)),       # ln1 beta
            pad_row(jnp.zeros(I)),       # b1
            pad_row(jnp.zeros(H)),       # b2
            pad_row(jnp.ones(H)),        # ln2 gamma
            pad_row(jnp.zeros(H)),       # ln2 beta
        ]
    small = jnp.stack(rows, axis=0)                                    # (21, 128)
    assert small.shape == (N_SMALL_ROWS, PACK_W)

    return {"word_emb": word_emb, "pos_emb": pos_emb, "type_emb": type_emb,
            "big_hw": big_hw, "w2_pool": w2_pool, "small": small}


# ----------------------------- forward pass -----------------------------------
def sentbert_forward(params, input_ids, attention_mask, token_type_ids):
    """Returns pooler_output: (B, H) float32 (eval mode, dropout = identity)."""
    # Embedding lookups stay as XLA gather glue (fused into one pre-kernel op);
    # everything after runs in one pallas_call with only 4 operands.
    emb = (jnp.take(params["word_emb"], input_ids, axis=0)
           + params["pos_emb"][None, :, :]
           + jnp.take(params["type_emb"], token_type_ids, axis=0))     # (B, L, H)
    emb = emb.reshape(B * L, H).astype(jnp.float32)

    # Additive attention-mask bias packed into the small-parameter array
    # (1 = attend, 0 = pad).
    mask_bias = (1.0 - attention_mask.astype(jnp.float32)) * (-1e9)    # (B, L)
    small = params["small"].at[ROW_MASK:ROW_MASK + B, :L].set(mask_bias)

    return pl.pallas_call(
        sentbert_kernel,
        out_shape=jax.ShapeDtypeStruct((B, H), jnp.float32),
    )(emb, small, params["big_hw"], params["w2_pool"])


# TODO(synk): BertTokenizer text preprocessing, pretrained checkpoint loading,
# and nn.DataParallel device placement have no Pallas equivalent; synthetic
# (input_ids, attention_mask, token_type_ids) stand in for text_to_batch_transformer.


if __name__ == "__main__":
    key = jax.random.PRNGKey(0)
    k_param, k_ids, k_seg = jax.random.split(key, 3)

    params = init_params(k_param)

    input_ids = jax.random.randint(k_ids, (B, L), 0, VOCAB, dtype=jnp.int32)
    lengths = jnp.array([L, 5], dtype=jnp.int32)              # one padded sentence
    attention_mask = (jnp.arange(L)[None, :] < lengths[:, None]).astype(jnp.int32)
    token_type_ids = jnp.zeros((B, L), dtype=jnp.int32)

    fwd = jax.jit(functools.partial(sentbert_forward, params))
    pooler_output = fwd(input_ids, attention_mask, token_type_ids)
    pooler_output = jax.block_until_ready(pooler_output)

    assert pooler_output.shape == (B, H)
    assert pooler_output.dtype == jnp.float32
    assert bool(jnp.all(jnp.isfinite(pooler_output)))
    print("KERNEL_OK")
</pallas_src>

<mosaic_0001>
module attributes {stable_mosaic.version = 11 : i64} {
  func.func @sentbert_kernel(%arg0: memref<16x32xf32, #tpu.memory_space<vmem>>, %arg1: memref<21x128xf32, #tpu.memory_space<vmem>>, %arg2: memref<2x32x192xf32, #tpu.memory_space<vmem>>, %arg3: memref<160x32xf32, #tpu.memory_space<vmem>>, %arg4: memref<2x32xf32, #tpu.memory_space<vmem>>) attributes {dimension_semantics = [], scalar_prefetch = 0 : i64, scratch_operands = 0 : i64, tpu.core_type = #tpu.core_type<tc>} {
    %c0 = arith.constant 0 : index
    %c0_0 = arith.constant 0 : index
    %0 = vector.load %arg0[%c0, %c0_0] : memref<16x32xf32, #tpu.memory_space<vmem>>, vector<16x32xf32>
    %c0_1 = arith.constant 0 : index
    %c0_2 = arith.constant 0 : index
    %1 = vector.load %arg1[%c0_1, %c0_2] : memref<21x128xf32, #tpu.memory_space<vmem>>, vector<1x32xf32>
    %c1 = arith.constant 1 : index
    %c0_3 = arith.constant 0 : index
    %2 = vector.load %arg1[%c1, %c0_3] : memref<21x128xf32, #tpu.memory_space<vmem>>, vector<1x32xf32>
    %cst = arith.constant dense<0.000000e+00> : vector<16xf32>
    %3 = vector.multi_reduction <add>, %0, %cst [1] : vector<16x32xf32> to vector<16xf32>
    %4 = vector.shape_cast %3 : vector<16xf32> to vector<16x1xf32>
    %cst_4 = arith.constant 3.200000e+01 : f32
    %5 = vector.broadcast %cst_4 : f32 to vector<16x1xf32>
    %6 = arith.divf %4, %5 : vector<16x1xf32>
    %7 = vector.broadcast %6 : vector<16x1xf32> to vector<16x32xf32>
    %8 = arith.subf %0, %7 : vector<16x32xf32>
    %9 = arith.mulf %8, %8 : vector<16x32xf32>
    %cst_5 = arith.constant dense<0.000000e+00> : vector<16xf32>
    %10 = vector.multi_reduction <add>, %9, %cst_5 [1] : vector<16x32xf32> to vector<16xf32>
    %11 = vector.shape_cast %10 : vector<16xf32> to vector<16x1xf32>
    %cst_6 = arith.constant 3.200000e+01 : f32
    %12 = vector.broadcast %cst_6 : f32 to vector<16x1xf32>
    %13 = arith.divf %11, %12 : vector<16x1xf32>
    %cst_7 = arith.constant 9.99999996E-13 : f32
    %14 = vector.broadcast %cst_7 : f32 to vector<16x1xf32>
    %15 = arith.addf %13, %14 : vector<16x1xf32>
    %16 = math.rsqrt %15 : vector<16x1xf32>
    %17 = vector.broadcast %16 : vector<16x1xf32> to vector<16x32xf32>
    %18 = arith.mulf %8, %17 : vector<16x32xf32>
    %19 = vector.broadcast %1 : vector<1x32xf32> to vector<16x32xf32>
    %20 = arith.mulf %18, %19 : vector<16x32xf32>
    %21 = vector.broadcast %2 : vector<1x32xf32> to vector<16x32xf32>
    %22 = arith.addf %20, %21 : vector<16x32xf32>
    %c3 = arith.constant 3 : index
    %c0_8 = arith.constant 0 : index
    %23 = vector.load %arg1[%c3, %c0_8] : memref<21x128xf32, #tpu.memory_space<vmem>>, vector<2x8xf32>
    %24 = vector.shape_cast %23 : vector<2x8xf32> to vector<2x1x8xf32>
    %c0_9 = arith.constant 0 : index
    %c0_10 = arith.constant 0 : index
    %c0_11 = arith.constant 0 : index
    %25 = vector.load %arg2[%c0_9, %c0_10, %c0_11] : memref<2x32x192xf32, #tpu.memory_space<vmem>>, vector<1x32x192xf32>
    %26 = vector.shape_cast %25 : vector<1x32x192xf32> to vector<32x192xf32>
    %27 = vector.extract_strided_slice %26 {offsets = [0, 0], sizes = [32, 96], strides = [1, 1]} : vector<32x192xf32> to vector<32x96xf32>
    %28 = vector.extract_strided_slice %26 {offsets = [0, 96], sizes = [32, 32], strides = [1, 1]} : vector<32x192xf32> to vector<32x32xf32>
    %29 = vector.extract_strided_slice %26 {offsets = [0, 128], sizes = [32, 64], strides = [1, 1]} : vector<32x192xf32> to vector<32x64xf32>
    %c0_12 = arith.constant 0 : index
    %c0_13 = arith.constant 0 : index
    %30 = vector.load %arg3[%c0_12, %c0_13] : memref<160x32xf32, #tpu.memory_space<vmem>>, vector<64x32xf32>
    %cst_14 = arith.constant dense<0.000000e+00> : vector<16x96xf32>
    %31 = tpu.matmul %22, %27, %cst_14 {dimension_numbers = #tpu.dot_dimension_numbers<[1], [0], [0], [1], [0, 0, 1, 1], [], []>} : vector<16x32xf32>, vector<32x96xf32>, vector<16x96xf32> -> vector<16x96xf32>
    %c5 = arith.constant 5 : index
    %c0_15 = arith.constant 0 : index
    %32 = vector.load %arg1[%c5, %c0_15] : memref<21x128xf32, #tpu.memory_space<vmem>>, vector<1x96xf32>
    %33 = vector.broadcast %32 : vector<1x96xf32> to vector<16x96xf32>
    %34 = arith.addf %31, %33 : vector<16x96xf32>
    %c6 = arith.constant 6 : index
    %c0_16 = arith.constant 0 : index
    %35 = vector.load %arg1[%c6, %c0_16] : memref<21x128xf32, #tpu.memory_space<vmem>>, vector<1x32xf32>
    %36 = vector.broadcast %35 : vector<1x32xf32> to vector<16x32xf32>
    %37 = arith.addf %22, %36 : vector<16x32xf32>
    %38 = vector.extract_strided_slice %34 {offsets = [0, 0], sizes = [16, 16], strides = [1, 1]} : vector<16x96xf32> to vector<16x16xf32>
    %39 = vector.shape_cast %38 : vector<16x16xf32> to vector<2x8x16xf32>
    %40 = vector.extract_strided_slice %34 {offsets = [0, 32], sizes = [16, 16], strides = [1, 1]} : vector<16x96xf32> to vector<16x16xf32>
    %41 = vector.shape_cast %40 : vector<16x16xf32> to vector<2x8x16xf32>
    %42 = vector.extract_strided_slice %34 {offsets = [0, 64], sizes = [16, 16], strides = [1, 1]} : vector<16x96xf32> to vector<16x16xf32>
    %43 = vector.shape_cast %42 : vector<16x16xf32> to vector<2x8x16xf32>
    "tpu.trace_start"() <{level = 10 : i32, message = "bqd,bkd->bqk"}> : () -> ()
    %cst_17 = arith.constant dense<0.000000e+00> : vector<2x8x8xf32>
    %44 = tpu.matmul %39, %41, %cst_17 {dimension_numbers = #tpu.dot_dimension_numbers<[2], [2], [1], [1], [0, 0, 0, 1, 1, 1], [0], [0]>} : vector<2x8x16xf32>, vector<2x8x16xf32>, vector<2x8x8xf32> -> vector<2x8x8xf32>
    "tpu.trace_stop"() : () -> ()
    %cst_18 = arith.constant 2.500000e-01 : f32
    %45 = vector.broadcast %cst_18 : f32 to vector<2x8x8xf32>
    %46 = arith.mulf %44, %45 : vector<2x8x8xf32>
    %47 = vector.broadcast %24 : vector<2x1x8xf32> to vector<2x8x8xf32>
    %48 = arith.addf %46, %47 : vector<2x8x8xf32>
    %cst_19 = arith.constant dense<0xFF800000> : vector<2x8xf32>
    %49 = vector.multi_reduction <maximumf>, %48, %cst_19 [2] : vector<2x8x8xf32> to vector<2x8xf32>
    %50 = vector.shape_cast %49 : vector<2x8xf32> to vector<2x8x1xf32>
    %51 = vector.broadcast %50 : vector<2x8x1xf32> to vector<2x8x8xf32>
    %52 = arith.subf %48, %51 : vector<2x8x8xf32>
    %53 = math.exp %52 : vector<2x8x8xf32>
    %cst_20 = arith.constant dense<0.000000e+00> : vector<2x8xf32>
    %54 = vector.multi_reduction <add>, %53, %cst_20 [2] : vector<2x8x8xf32> to vector<2x8xf32>
    %55 = vector.shape_cast %54 : vector<2x8xf32> to vector<2x8x1xf32>
    %56 = tpu.reciprocal %55 : vector<2x8x1xf32> -> vector<2x8x1xf32>
    %57 = vector.broadcast %56 : vector<2x8x1xf32> to vector<2x8x8xf32>
    %58 = arith.mulf %53, %57 : vector<2x8x8xf32>
    "tpu.trace_start"() <{level = 10 : i32, message = "bqk,bkd->bqd"}> : () -> ()
    %cst_21 = arith.constant dense<0.000000e+00> : vector<2x8x16xf32>
    %59 = tpu.matmul %58, %43, %cst_21 {dimension_numbers = #tpu.dot_dimension_numbers<[2], [1], [1], [2], [0, 0, 0, 1, 1, 2], [0], [0]>} : vector<2x8x8xf32>, vector<2x8x16xf32>, vector<2x8x16xf32> -> vector<2x8x16xf32>
    "tpu.trace_stop"() : () -> ()
    %60 = vector.shape_cast %59 : vector<2x8x16xf32> to vector<16x16xf32>
    %61 = vector.extract_strided_slice %28 {offsets = [0, 0], sizes = [16, 32], strides = [1, 1]} : vector<32x32xf32> to vector<16x32xf32>
    %cst_22 = arith.constant dense<0.000000e+00> : vector<16x32xf32>
    %62 = tpu.matmul %60, %61, %cst_22 {dimension_numbers = #tpu.dot_dimension_numbers<[1], [0], [0], [1], [0, 0, 1, 1], [], []>} : vector<16x16xf32>, vector<16x32xf32>, vector<16x32xf32> -> vector<16x32xf32>
    %63 = arith.addf %37, %62 : vector<16x32xf32>
    %64 = vector.extract_strided_slice %34 {offsets = [0, 16], sizes = [16, 16], strides = [1, 1]} : vector<16x96xf32> to vector<16x16xf32>
    %65 = vector.shape_cast %64 : vector<16x16xf32> to vector<2x8x16xf32>
    %66 = vector.extract_strided_slice %34 {offsets = [0, 48], sizes = [16, 16], strides = [1, 1]} : vector<16x96xf32> to vector<16x16xf32>
    %67 = vector.shape_cast %66 : vector<16x16xf32> to vector<2x8x16xf32>
    %68 = vector.extract_strided_slice %34 {offsets = [0, 80], sizes = [16, 16], strides = [1, 1]} : vector<16x96xf32> to vector<16x16xf32>
    %69 = vector.shape_cast %68 : vector<16x16xf32> to vector<2x8x16xf32>
    "tpu.trace_start"() <{level = 10 : i32, message = "bqd,bkd->bqk"}> : () -> ()
    %cst_23 = arith.constant dense<0.000000e+00> : vector<2x8x8xf32>
    %70 = tpu.matmul %65, %67, %cst_23 {dimension_numbers = #tpu.dot_dimension_numbers<[2], [2], [1], [1], [0, 0, 0, 1, 1, 1], [0], [0]>} : vector<2x8x16xf32>, vector<2x8x16xf32>, vector<2x8x8xf32> -> vector<2x8x8xf32>
    "tpu.trace_stop"() : () -> ()
    %cst_24 = arith.constant 2.500000e-01 : f32
    %71 = vector.broadcast %cst_24 : f32 to vector<2x8x8xf32>
    %72 = arith.mulf %70, %71 : vector<2x8x8xf32>
    %73 = vector.broadcast %24 : vector<2x1x8xf32> to vector<2x8x8xf32>
    %74 = arith.addf %72, %73 : vector<2x8x8xf32>
    %cst_25 = arith.constant dense<0xFF800000> : vector<2x8xf32>
    %75 = vector.multi_reduction <maximumf>, %74, %cst_25 [2] : vector<2x8x8xf32> to vector<2x8xf32>
    %76 = vector.shape_cast %75 : vector<2x8xf32> to vector<2x8x1xf32>
    %77 = vector.broadcast %76 : vector<2x8x1xf32> to vector<2x8x8xf32>
    %78 = arith.subf %74, %77 : vector<2x8x8xf32>
    %79 = math.exp %78 : vector<2x8x8xf32>
    %cst_26 = arith.constant dense<0.000000e+00> : vector<2x8xf32>
    %80 = vector.multi_reduction <add>, %79, %cst_26 [2] : vector<2x8x8xf32> to vector<2x8xf32>
    %81 = vector.shape_cast %80 : vector<2x8xf32> to vector<2x8x1xf32>
    %82 = tpu.reciprocal %81 : vector<2x8x1xf32> -> vector<2x8x1xf32>
    %83 = vector.broadcast %82 : vector<2x8x1xf32> to vector<2x8x8xf32>
    %84 = arith.mulf %79, %83 : vector<2x8x8xf32>
    "tpu.trace_start"() <{level = 10 : i32, message = "bqk,bkd->bqd"}> : () -> ()
    %cst_27 = arith.constant dense<0.000000e+00> : vector<2x8x16xf32>
    %85 = tpu.matmul %84, %69, %cst_27 {dimension_numbers = #tpu.dot_dimension_numbers<[2], [1], [1], [2], [0, 0, 0, 1, 1, 2], [0], [0]>} : vector<2x8x8xf32>, vector<2x8x16xf32>, vector<2x8x16xf32> -> vector<2x8x16xf32>
    "tpu.trace_stop"() : () -> ()
    %86 = vector.shape_cast %85 : vector<2x8x16xf32> to vector<16x16xf32>
    %87 = vector.extract_strided_slice %28 {offsets = [16, 0], sizes = [16, 32], strides = [1, 1]} : vector<32x32xf32> to vector<16x32xf32>
    %cst_28 = arith.constant dense<0.000000e+00> : vector<16x32xf32>
    %88 = tpu.matmul %86, %87, %cst_28 {dimension_numbers = #tpu.dot_dimension_numbers<[1], [0], [0], [1], [0, 0, 1, 1], [], []>} : vector<16x16xf32>, vector<16x32xf32>, vector<16x32xf32> -> vector<16x32xf32>
    %89 = arith.addf %63, %88 : vector<16x32xf32>
    %c7 = arith.constant 7 : index
    %c0_29 = arith.constant 0 : index
    %90 = vector.load %arg1[%c7, %c0_29] : memref<21x128xf32, #tpu.memory_space<vmem>>, vector<1x32xf32>
    %c8 = arith.constant 8 : index
    %c0_30 = arith.constant 0 : index
    %91 = vector.load %arg1[%c8, %c0_30] : memref<21x128xf32, #tpu.memory_space<vmem>>, vector<1x32xf32>
    %cst_31 = arith.constant dense<0.000000e+00> : vector<16xf32>
    %92 = vector.multi_reduction <add>, %89, %cst_31 [1] : vector<16x32xf32> to vector<16xf32>
    %93 = vector.shape_cast %92 : vector<16xf32> to vector<16x1xf32>
    %cst_32 = arith.constant 3.200000e+01 : f32
    %94 = vector.broadcast %cst_32 : f32 to vector<16x1xf32>
    %95 = arith.divf %93, %94 : vector<16x1xf32>
    %96 = vector.broadcast %95 : vector<16x1xf32> to vector<16x32xf32>
    %97 = arith.subf %89, %96 : vector<16x32xf32>
    %98 = arith.mulf %97, %97 : vector<16x32xf32>
    %cst_33 = arith.constant dense<0.000000e+00> : vector<16xf32>
    %99 = vector.multi_reduction <add>, %98, %cst_33 [1] : vector<16x32xf32> to vector<16xf32>
    %100 = vector.shape_cast %99 : vector<16xf32> to vector<16x1xf32>
    %cst_34 = arith.constant 3.200000e+01 : f32
    %101 = vector.broadcast %cst_34 : f32 to vector<16x1xf32>
    %102 = arith.divf %100, %101 : vector<16x1xf32>
    %cst_35 = arith.constant 9.99999996E-13 : f32
    %103 = vector.broadcast %cst_35 : f32 to vector<16x1xf32>
    %104 = arith.addf %102, %103 : vector<16x1xf32>
    %105 = math.rsqrt %104 : vector<16x1xf32>
    %106 = vector.broadcast %105 : vector<16x1xf32> to vector<16x32xf32>
    %107 = arith.mulf %97, %106 : vector<16x32xf32>
    %108 = vector.broadcast %90 : vector<1x32xf32> to vector<16x32xf32>
    %109 = arith.mulf %107, %108 : vector<16x32xf32>
    %110 = vector.broadcast %91 : vector<1x32xf32> to vector<16x32xf32>
    %111 = arith.addf %109, %110 : vector<16x32xf32>
    %cst_36 = arith.constant dense<0.000000e+00> : vector<16x64xf32>
    %112 = tpu.matmul %111, %29, %cst_36 {dimension_numbers = #tpu.dot_dimension_numbers<[1], [0], [0], [1], [0, 0, 1, 1], [], []>} : vector<16x32xf32>, vector<32x64xf32>, vector<16x64xf32> -> vector<16x64xf32>
    %c9 = arith.constant 9 : index
    %c0_37 = arith.constant 0 : index
    %113 = vector.load %arg1[%c9, %c0_37] : memref<21x128xf32, #tpu.memory_space<vmem>>, vector<1x64xf32>
    %114 = vector.broadcast %113 : vector<1x64xf32> to vector<16x64xf32>
    %115 = arith.addf %112, %114 : vector<16x64xf32>
    %cst_38 = arith.constant 5.000000e-01 : f32
    %116 = vector.broadcast %cst_38 : f32 to vector<16x64xf32>
    %117 = arith.mulf %116, %115 : vector<16x64xf32>
    %cst_39 = arith.constant 4.471500e-02 : f32
    %118 = vector.broadcast %cst_39 : f32 to vector<16x64xf32>
    %119 = arith.mulf %118, %115 : vector<16x64xf32>
    %120 = arith.mulf %119, %115 : vector<16x64xf32>
    %121 = arith.mulf %120, %115 : vector<16x64xf32>
    %122 = arith.addf %115, %121 : vector<16x64xf32>
    %cst_40 = arith.constant 0.797884583 : f32
    %123 = vector.broadcast %cst_40 : f32 to vector<16x64xf32>
    %124 = arith.mulf %123, %122 : vector<16x64xf32>
    %125 = math.tanh %124 : vector<16x64xf32>
    %cst_41 = arith.constant 1.000000e+00 : f32
    %126 = vector.broadcast %cst_41 : f32 to vector<16x64xf32>
    %127 = arith.addf %126, %125 : vector<16x64xf32>
    %128 = arith.mulf %117, %127 : vector<16x64xf32>
    %cst_42 = arith.constant dense<0.000000e+00> : vector<16x32xf32>
    %129 = tpu.matmul %128, %30, %cst_42 {dimension_numbers = #tpu.dot_dimension_numbers<[1], [0], [0], [1], [0, 0, 1, 1], [], []>} : vector<16x64xf32>, vector<64x32xf32>, vector<16x32xf32> -> vector<16x32xf32>
    %c10 = arith.constant 10 : index
    %c0_43 = arith.constant 0 : index
    %130 = vector.load %arg1[%c10, %c0_43] : memref<21x128xf32, #tpu.memory_space<vmem>>, vector<1x32xf32>
    %131 = vector.broadcast %130 : vector<1x32xf32> to vector<16x32xf32>
    %132 = arith.addf %129, %131 : vector<16x32xf32>
    %133 = arith.addf %132, %111 : vector<16x32xf32>
    %c11 = arith.constant 11 : index
    %c0_44 = arith.constant 0 : index
    %134 = vector.load %arg1[%c11, %c0_44] : memref<21x128xf32, #tpu.memory_space<vmem>>, vector<1x32xf32>
    %c12 = arith.constant 12 : index
    %c0_45 = arith.constant 0 : index
    %135 = vector.load %arg1[%c12, %c0_45] : memref<21x128xf32, #tpu.memory_space<vmem>>, vector<1x32xf32>
    %cst_46 = arith.constant dense<0.000000e+00> : vector<16xf32>
    %136 = vector.multi_reduction <add>, %133, %cst_46 [1] : vector<16x32xf32> to vector<16xf32>
    %137 = vector.shape_cast %136 : vector<16xf32> to vector<16x1xf32>
    %cst_47 = arith.constant 3.200000e+01 : f32
    %138 = vector.broadcast %cst_47 : f32 to vector<16x1xf32>
    %139 = arith.divf %137, %138 : vector<16x1xf32>
    %140 = vector.broadcast %139 : vector<16x1xf32> to vector<16x32xf32>
    %141 = arith.subf %133, %140 : vector<16x32xf32>
    %142 = arith.mulf %141, %141 : vector<16x32xf32>
    %cst_48 = arith.constant dense<0.000000e+00> : vector<16xf32>
    %143 = vector.multi_reduction <add>, %142, %cst_48 [1] : vector<16x32xf32> to vector<16xf32>
    %144 = vector.shape_cast %143 : vector<16xf32> to vector<16x1xf32>
    %cst_49 = arith.constant 3.200000e+01 : f32
    %145 = vector.broadcast %cst_49 : f32 to vector<16x1xf32>
    %146 = arith.divf %144, %145 : vector<16x1xf32>
    %cst_50 = arith.constant 9.99999996E-13 : f32
    %147 = vector.broadcast %cst_50 : f32 to vector<16x1xf32>
    %148 = arith.addf %146, %147 : vector<16x1xf32>
    %149 = math.rsqrt %148 : vector<16x1xf32>
    %150 = vector.broadcast %149 : vector<16x1xf32> to vector<16x32xf32>
    %151 = arith.mulf %141, %150 : vector<16x32xf32>
    %152 = vector.broadcast %134 : vector<1x32xf32> to vector<16x32xf32>
    %153 = arith.mulf %151, %152 : vector<16x32xf32>
    %154 = vector.broadcast %135 : vector<1x32xf32> to vector<16x32xf32>
    %155 = arith.addf %153, %154 : vector<16x32xf32>
    %c1_51 = arith.constant 1 : index
    %c0_52 = arith.constant 0 : index
    %c0_53 = arith.constant 0 : index
    %156 = vector.load %arg2[%c1_51, %c0_52, %c0_53] : memref<2x32x192xf32, #tpu.memory_space<vmem>>, vector<1x32x192xf32>
    %157 = vector.shape_cast %156 : vector<1x32x192xf32> to vector<32x192xf32>
    %158 = vector.extract_strided_slice %157 {offsets = [0, 0], sizes = [32, 96], strides = [1, 1]} : vector<32x192xf32> to vector<32x96xf32>
    %159 = vector.extract_strided_slice %157 {offsets = [0, 96], sizes = [32, 32], strides = [1, 1]} : vector<32x192xf32> to vector<32x32xf32>
    %160 = vector.extract_strided_slice %157 {offsets = [0, 128], sizes = [32, 64], strides = [1, 1]} : vector<32x192xf32> to vector<32x64xf32>
    %c64 = arith.constant 64 : index
    %c0_54 = arith.constant 0 : index
    %161 = vector.load %arg3[%c64, %c0_54] : memref<160x32xf32, #tpu.memory_space<vmem>>, vector<64x32xf32>
    %cst_55 = arith.constant dense<0.000000e+00> : vector<16x96xf32>
    %162 = tpu.matmul %155, %158, %cst_55 {dimension_numbers = #tpu.dot_dimension_numbers<[1], [0], [0], [1], [0, 0, 1, 1], [], []>} : vector<16x32xf32>, vector<32x96xf32>, vector<16x96xf32> -> vector<16x96xf32>
    %c13 = arith.constant 13 : index
    %c0_56 = arith.constant 0 : index
    %163 = vector.load %arg1[%c13, %c0_56] : memref<21x128xf32, #tpu.memory_space<vmem>>, vector<1x96xf32>
    %164 = vector.broadcast %163 : vector<1x96xf32> to vector<16x96xf32>
    %165 = arith.addf %162, %164 : vector<16x96xf32>
    %c14 = arith.constant 14 : index
    %c0_57 = arith.constant 0 : index
    %166 = vector.load %arg1[%c14, %c0_57] : memref<21x128xf32, #tpu.memory_space<vmem>>, vector<1x32xf32>
    %167 = vector.broadcast %166 : vector<1x32xf32> to vector<16x32xf32>
    %168 = arith.addf %155, %167 : vector<16x32xf32>
    %169 = vector.extract_strided_slice %165 {offsets = [0, 0], sizes = [16, 16], strides = [1, 1]} : vector<16x96xf32> to vector<16x16xf32>
    %170 = vector.shape_cast %169 : vector<16x16xf32> to vector<2x8x16xf32>
    %171 = vector.extract_strided_slice %165 {offsets = [0, 32], sizes = [16, 16], strides = [1, 1]} : vector<16x96xf32> to vector<16x16xf32>
    %172 = vector.shape_cast %171 : vector<16x16xf32> to vector<2x8x16xf32>
    %173 = vector.extract_strided_slice %165 {offsets = [0, 64], sizes = [16, 16], strides = [1, 1]} : vector<16x96xf32> to vector<16x16xf32>
    %174 = vector.shape_cast %173 : vector<16x16xf32> to vector<2x8x16xf32>
    "tpu.trace_start"() <{level = 10 : i32, message = "bqd,bkd->bqk"}> : () -> ()
    %cst_58 = arith.constant dense<0.000000e+00> : vector<2x8x8xf32>
    %175 = tpu.matmul %170, %172, %cst_58 {dimension_numbers = #tpu.dot_dimension_numbers<[2], [2], [1], [1], [0, 0, 0, 1, 1, 1], [0], [0]>} : vector<2x8x16xf32>, vector<2x8x16xf32>, vector<2x8x8xf32> -> vector<2x8x8xf32>
    "tpu.trace_stop"() : () -> ()
    %cst_59 = arith.constant 2.500000e-01 : f32
    %176 = vector.broadcast %cst_59 : f32 to vector<2x8x8xf32>
    %177 = arith.mulf %175, %176 : vector<2x8x8xf32>
    %178 = vector.broadcast %24 : vector<2x1x8xf32> to vector<2x8x8xf32>
    %179 = arith.addf %177, %178 : vector<2x8x8xf32>
    %cst_60 = arith.constant dense<0xFF800000> : vector<2x8xf32>
    %180 = vector.multi_reduction <maximumf>, %179, %cst_60 [2] : vector<2x8x8xf32> to vector<2x8xf32>
    %181 = vector.shape_cast %180 : vector<2x8xf32> to vector<2x8x1xf32>
    %182 = vector.broadcast %181 : vector<2x8x1xf32> to vector<2x8x8xf32>
    %183 = arith.subf %179, %182 : vector<2x8x8xf32>
    %184 = math.exp %183 : vector<2x8x8xf32>
    %cst_61 = arith.constant dense<0.000000e+00> : vector<2x8xf32>
    %185 = vector.multi_reduction <add>, %184, %cst_61 [2] : vector<2x8x8xf32> to vector<2x8xf32>
    %186 = vector.shape_cast %185 : vector<2x8xf32> to vector<2x8x1xf32>
    %187 = tpu.reciprocal %186 : vector<2x8x1xf32> -> vector<2x8x1xf32>
    %188 = vector.broadcast %187 : vector<2x8x1xf32> to vector<2x8x8xf32>
    %189 = arith.mulf %184, %188 : vector<2x8x8xf32>
    "tpu.trace_start"() <{level = 10 : i32, message = "bqk,bkd->bqd"}> : () -> ()
    %cst_62 = arith.constant dense<0.000000e+00> : vector<2x8x16xf32>
    %190 = tpu.matmul %189, %174, %cst_62 {dimension_numbers = #tpu.dot_dimension_numbers<[2], [1], [1], [2], [0, 0, 0, 1, 1, 2], [0], [0]>} : vector<2x8x8xf32>, vector<2x8x16xf32>, vector<2x8x16xf32> -> vector<2x8x16xf32>
    "tpu.trace_stop"() : () -> ()
    %191 = vector.shape_cast %190 : vector<2x8x16xf32> to vector<16x16xf32>
    %192 = vector.extract_strided_slice %159 {offsets = [0, 0], sizes = [16, 32], strides = [1, 1]} : vector<32x32xf32> to vector<16x32xf32>
    %cst_63 = arith.constant dense<0.000000e+00> : vector<16x32xf32>
    %193 = tpu.matmul %191, %192, %cst_63 {dimension_numbers = #tpu.dot_dimension_numbers<[1], [0], [0], [1], [0, 0, 1, 1], [], []>} : vector<16x16xf32>, vector<16x32xf32>, vector<16x32xf32> -> vector<16x32xf32>
    %194 = arith.addf %168, %193 : vector<16x32xf32>
    %195 = vector.extract_strided_slice %165 {offsets = [0, 16], sizes = [16, 16], strides = [1, 1]} : vector<16x96xf32> to vector<16x16xf32>
    %196 = vector.shape_cast %195 : vector<16x16xf32> to vector<2x8x16xf32>
    %197 = vector.extract_strided_slice %165 {offsets = [0, 48], sizes = [16, 16], strides = [1, 1]} : vector<16x96xf32> to vector<16x16xf32>
    %198 = vector.shape_cast %197 : vector<16x16xf32> to vector<2x8x16xf32>
    %199 = vector.extract_strided_slice %165 {offsets = [0, 80], sizes = [16, 16], strides = [1, 1]} : vector<16x96xf32> to vector<16x16xf32>
    %200 = vector.shape_cast %199 : vector<16x16xf32> to vector<2x8x16xf32>
    "tpu.trace_start"() <{level = 10 : i32, message = "bqd,bkd->bqk"}> : () -> ()
    %cst_64 = arith.constant dense<0.000000e+00> : vector<2x8x8xf32>
    %201 = tpu.matmul %196, %198, %cst_64 {dimension_numbers = #tpu.dot_dimension_numbers<[2], [2], [1], [1], [0, 0, 0, 1, 1, 1], [0], [0]>} : vector<2x8x16xf32>, vector<2x8x16xf32>, vector<2x8x8xf32> -> vector<2x8x8xf32>
    "tpu.trace_stop"() : () -> ()
    %cst_65 = arith.constant 2.500000e-01 : f32
    %202 = vector.broadcast %cst_65 : f32 to vector<2x8x8xf32>
    %203 = arith.mulf %201, %202 : vector<2x8x8xf32>
    %204 = vector.broadcast %24 : vector<2x1x8xf32> to vector<2x8x8xf32>
    %205 = arith.addf %203, %204 : vector<2x8x8xf32>
    %cst_66 = arith.constant dense<0xFF800000> : vector<2x8xf32>
    %206 = vector.multi_reduction <maximumf>, %205, %cst_66 [2] : vector<2x8x8xf32> to vector<2x8xf32>
    %207 = vector.shape_cast %206 : vector<2x8xf32> to vector<2x8x1xf32>
    %208 = vector.broadcast %207 : vector<2x8x1xf32> to vector<2x8x8xf32>
    %209 = arith.subf %205, %208 : vector<2x8x8xf32>
    %210 = math.exp %209 : vector<2x8x8xf32>
    %cst_67 = arith.constant dense<0.000000e+00> : vector<2x8xf32>
    %211 = vector.multi_reduction <add>, %210, %cst_67 [2] : vector<2x8x8xf32> to vector<2x8xf32>
    %212 = vector.shape_cast %211 : vector<2x8xf32> to vector<2x8x1xf32>
    %213 = tpu.reciprocal %212 : vector<2x8x1xf32> -> vector<2x8x1xf32>
    %214 = vector.broadcast %213 : vector<2x8x1xf32> to vector<2x8x8xf32>
    %215 = arith.mulf %210, %214 : vector<2x8x8xf32>
    "tpu.trace_start"() <{level = 10 : i32, message = "bqk,bkd->bqd"}> : () -> ()
    %cst_68 = arith.constant dense<0.000000e+00> : vector<2x8x16xf32>
    %216 = tpu.matmul %215, %200, %cst_68 {dimension_numbers = #tpu.dot_dimension_numbers<[2], [1], [1], [2], [0, 0, 0, 1, 1, 2], [0], [0]>} : vector<2x8x8xf32>, vector<2x8x16xf32>, vector<2x8x16xf32> -> vector<2x8x16xf32>
    "tpu.trace_stop"() : () -> ()
    %217 = vector.shape_cast %216 : vector<2x8x16xf32> to vector<16x16xf32>
    %218 = vector.extract_strided_slice %159 {offsets = [16, 0], sizes = [16, 32], strides = [1, 1]} : vector<32x32xf32> to vector<16x32xf32>
    %cst_69 = arith.constant dense<0.000000e+00> : vector<16x32xf32>
    %219 = tpu.matmul %217, %218, %cst_69 {dimension_numbers = #tpu.dot_dimension_numbers<[1], [0], [0], [1], [0, 0, 1, 1], [], []>} : vector<16x16xf32>, vector<16x32xf32>, vector<16x32xf32> -> vector<16x32xf32>
    %220 = arith.addf %194, %219 : vector<16x32xf32>
    %c15 = arith.constant 15 : index
    %c0_70 = arith.constant 0 : index
    %221 = vector.load %arg1[%c15, %c0_70] : memref<21x128xf32, #tpu.memory_space<vmem>>, vector<1x32xf32>
    %c16 = arith.constant 16 : index
    %c0_71 = arith.constant 0 : index
    %222 = vector.load %arg1[%c16, %c0_71] : memref<21x128xf32, #tpu.memory_space<vmem>>, vector<1x32xf32>
    %cst_72 = arith.constant dense<0.000000e+00> : vector<16xf32>
    %223 = vector.multi_reduction <add>, %220, %cst_72 [1] : vector<16x32xf32> to vector<16xf32>
    %224 = vector.shape_cast %223 : vector<16xf32> to vector<16x1xf32>
    %cst_73 = arith.constant 3.200000e+01 : f32
    %225 = vector.broadcast %cst_73 : f32 to vector<16x1xf32>
    %226 = arith.divf %224, %225 : vector<16x1xf32>
    %227 = vector.broadcast %226 : vector<16x1xf32> to vector<16x32xf32>
    %228 = arith.subf %220, %227 : vector<16x32xf32>
    %229 = arith.mulf %228, %228 : vector<16x32xf32>
    %cst_74 = arith.constant dense<0.000000e+00> : vector<16xf32>
    %230 = vector.multi_reduction <add>, %229, %cst_74 [1] : vector<16x32xf32> to vector<16xf32>
    %231 = vector.shape_cast %230 : vector<16xf32> to vector<16x1xf32>
    %cst_75 = arith.constant 3.200000e+01 : f32
    %232 = vector.broadcast %cst_75 : f32 to vector<16x1xf32>
    %233 = arith.divf %231, %232 : vector<16x1xf32>
    %cst_76 = arith.constant 9.99999996E-13 : f32
    %234 = vector.broadcast %cst_76 : f32 to vector<16x1xf32>
    %235 = arith.addf %233, %234 : vector<16x1xf32>
    %236 = math.rsqrt %235 : vector<16x1xf32>
    %237 = vector.broadcast %236 : vector<16x1xf32> to vector<16x32xf32>
    %238 = arith.mulf %228, %237 : vector<16x32xf32>
    %239 = vector.broadcast %221 : vector<1x32xf32> to vector<16x32xf32>
    %240 = arith.mulf %238, %239 : vector<16x32xf32>
    %241 = vector.broadcast %222 : vector<1x32xf32> to vector<16x32xf32>
    %242 = arith.addf %240, %241 : vector<16x32xf32>
    %cst_77 = arith.constant dense<0.000000e+00> : vector<16x64xf32>
    %243 = tpu.matmul %242, %160, %cst_77 {dimension_numbers = #tpu.dot_dimension_numbers<[1], [0], [0], [1], [0, 0, 1, 1], [], []>} : vector<16x32xf32>, vector<32x64xf32>, vector<16x64xf32> -> vector<16x64xf32>
    %c17 = arith.constant 17 : index
    %c0_78 = arith.constant 0 : index
    %244 = vector.load %arg1[%c17, %c0_78] : memref<21x128xf32, #tpu.memory_space<vmem>>, vector<1x64xf32>
    %245 = vector.broadcast %244 : vector<1x64xf32> to vector<16x64xf32>
    %246 = arith.addf %243, %245 : vector<16x64xf32>
    %cst_79 = arith.constant 5.000000e-01 : f32
    %247 = vector.broadcast %cst_79 : f32 to vector<16x64xf32>
    %248 = arith.mulf %247, %246 : vector<16x64xf32>
    %cst_80 = arith.constant 4.471500e-02 : f32
    %249 = vector.broadcast %cst_80 : f32 to vector<16x64xf32>
    %250 = arith.mulf %249, %246 : vector<16x64xf32>
    %251 = arith.mulf %250, %246 : vector<16x64xf32>
    %252 = arith.mulf %251, %246 : vector<16x64xf32>
    %253 = arith.addf %246, %252 : vector<16x64xf32>
    %cst_81 = arith.constant 0.797884583 : f32
    %254 = vector.broadcast %cst_81 : f32 to vector<16x64xf32>
    %255 = arith.mulf %254, %253 : vector<16x64xf32>
    %256 = math.tanh %255 : vector<16x64xf32>
    %cst_82 = arith.constant 1.000000e+00 : f32
    %257 = vector.broadcast %cst_82 : f32 to vector<16x64xf32>
    %258 = arith.addf %257, %256 : vector<16x64xf32>
    %259 = arith.mulf %248, %258 : vector<16x64xf32>
    %cst_83 = arith.constant dense<0.000000e+00> : vector<16x32xf32>
    %260 = tpu.matmul %259, %161, %cst_83 {dimension_numbers = #tpu.dot_dimension_numbers<[1], [0], [0], [1], [0, 0, 1, 1], [], []>} : vector<16x64xf32>, vector<64x32xf32>, vector<16x32xf32> -> vector<16x32xf32>
    %c18 = arith.constant 18 : index
    %c0_84 = arith.constant 0 : index
    %261 = vector.load %arg1[%c18, %c0_84] : memref<21x128xf32, #tpu.memory_space<vmem>>, vector<1x32xf32>
    %262 = vector.broadcast %261 : vector<1x32xf32> to vector<16x32xf32>
    %263 = arith.addf %260, %262 : vector<16x32xf32>
    %264 = arith.addf %263, %242 : vector<16x32xf32>
    %c19 = arith.constant 19 : index
    %c0_85 = arith.constant 0 : index
    %265 = vector.load %arg1[%c19, %c0_85] : memref<21x128xf32, #tpu.memory_space<vmem>>, vector<1x32xf32>
    %c20 = arith.constant 20 : index
    %c0_86 = arith.constant 0 : index
    %266 = vector.load %arg1[%c20, %c0_86] : memref<21x128xf32, #tpu.memory_space<vmem>>, vector<1x32xf32>
    %cst_87 = arith.constant dense<0.000000e+00> : vector<16xf32>
    %267 = vector.multi_reduction <add>, %264, %cst_87 [1] : vector<16x32xf32> to vector<16xf32>
    %268 = vector.shape_cast %267 : vector<16xf32> to vector<16x1xf32>
    %cst_88 = arith.constant 3.200000e+01 : f32
    %269 = vector.broadcast %cst_88 : f32 to vector<16x1xf32>
    %270 = arith.divf %268, %269 : vector<16x1xf32>
    %271 = vector.broadcast %270 : vector<16x1xf32> to vector<16x32xf32>
    %272 = arith.subf %264, %271 : vector<16x32xf32>
    %273 = arith.mulf %272, %272 : vector<16x32xf32>
    %cst_89 = arith.constant dense<0.000000e+00> : vector<16xf32>
    %274 = vector.multi_reduction <add>, %273, %cst_89 [1] : vector<16x32xf32> to vector<16xf32>
    %275 = vector.shape_cast %274 : vector<16xf32> to vector<16x1xf32>
    %cst_90 = arith.constant 3.200000e+01 : f32
    %276 = vector.broadcast %cst_90 : f32 to vector<16x1xf32>
    %277 = arith.divf %275, %276 : vector<16x1xf32>
    %cst_91 = arith.constant 9.99999996E-13 : f32
    %278 = vector.broadcast %cst_91 : f32 to vector<16x1xf32>
    %279 = arith.addf %277, %278 : vector<16x1xf32>
    %280 = math.rsqrt %279 : vector<16x1xf32>
    %281 = vector.broadcast %280 : vector<16x1xf32> to vector<16x32xf32>
    %282 = arith.mulf %272, %281 : vector<16x32xf32>
    %283 = vector.broadcast %265 : vector<1x32xf32> to vector<16x32xf32>
    %284 = arith.mulf %282, %283 : vector<16x32xf32>
    %285 = vector.broadcast %266 : vector<1x32xf32> to vector<16x32xf32>
    %286 = arith.addf %284, %285 : vector<16x32xf32>
    %c128 = arith.constant 128 : index
    %c0_92 = arith.constant 0 : index
    %287 = vector.load %arg3[%c128, %c0_92] : memref<160x32xf32, #tpu.memory_space<vmem>>, vector<32x32xf32>
    %288 = vector.extract_strided_slice %286 {offsets = [0, 0], sizes = [1, 32], strides = [1, 1]} : vector<16x32xf32> to vector<1x32xf32>
    %289 = vector.extract_strided_slice %286 {offsets = [8, 0], sizes = [1, 32], strides = [1, 1]} : vector<16x32xf32> to vector<1x32xf32>
    %290 = tpu.concatenate %288, %289 in 0 : vector<1x32xf32>, vector<1x32xf32> -> vector<2x32xf32>
    %cst_93 = arith.constant dense<0.000000e+00> : vector<2x32xf32>
    %291 = tpu.matmul %290, %287, %cst_93 {dimension_numbers = #tpu.dot_dimension_numbers<[1], [0], [0], [1], [0, 0, 1, 1], [], []>} : vector<2x32xf32>, vector<32x32xf32>, vector<2x32xf32> -> vector<2x32xf32>
    %c2 = arith.constant 2 : index
    %c0_94 = arith.constant 0 : index
    %292 = vector.load %arg1[%c2, %c0_94] : memref<21x128xf32, #tpu.memory_space<vmem>>, vector<1x32xf32>
    %293 = vector.broadcast %292 : vector<1x32xf32> to vector<2x32xf32>
    %294 = arith.addf %291, %293 : vector<2x32xf32>
    %295 = math.tanh %294 : vector<2x32xf32>
    %c0_95 = arith.constant 0 : index
    %c0_96 = arith.constant 0 : index
    %296 = vector.load %arg4[%c0_95, %c0_96] : memref<2x32xf32, #tpu.memory_space<vmem>>, vector<2x32xf32>
    tpu.vector_store %arg4[%c0_95, %c0_96], %295 {strides = array<i32>} : memref<2x32xf32, #tpu.memory_space<vmem>>, vector<2x32xf32>,
    return
  }
}

</mosaic_0001>

<bundles_post_ra>
// kernel: sentbert_forward.1
= control target key start
LH: loop header
LB: loop body
LE: loop exit
PB: predicated region body
PF: predicated region fallthrough
CT: control target
= control target key end

     0   :  { %vm22_vm0 = vcmask 261120   ;;  %s2066_s0 = inlined_call_operand.vmem [shape: f32[16,32], index: 0, kind: input, shape index: {}]   ;;  %s2067_s1 = inlined_call_operand.vmem [shape: f32[21,128], index: 1, kind: input, shape index: {}]   ;;  %s2068_s2 = inlined_call_operand.vmem [shape: f32[2,32,192], index: 2, kind: input, shape index: {}]   ;;  %s2069_s3 = inlined_call_operand.vmem [shape: f32[160,32], index: 3, kind: input, shape index: {}]   ;;  %s2070_s4 = inlined_call_operand.hbm [shape: f32[2,32], index: 4, kind: output, shape index: {}]  }
   0x1   :  { %v18_v0 = vld [vmem:[%s2066_s0] sm:$0xff]  ;;  %v19_v2 = vld [vmem:[%s2066_s0 + $0x8] sm:$0xff] }
   0x2   :  { %v23_v1 = vsel %vm22_vm0, %v18_v0, 0.0  ;;  %v26_v3 = vsel %vm22_vm0, %v19_v2, 0.0 }
   0x3   :  { %24 = vadd.xlane.f32.xlu0 %v23_v1 }
   0x4   :  { %9 = vsyncpa [#allocation3], 0  ;;  %v1600_v4 = vmov 32.0   ;;  %v1650_v21 = vld [vmem:[%s2068_s2 + $0x30] sm:$0xff]  ;;  %v1656_v22 = vld [vmem:[%s2068_s2 + $0x20] sm:$0xff]  ;;  %s1601_s8 = smov 80  }
   0x5   :  { %1510 = vrcp.f32 %v1600_v4  ;;  %119 = vmatpush.msra.mxu0 %v1650_v21  ;;  %v1662_v23 = vld [vmem:[%s2068_s2 + $0x10] sm:$0xff]  ;;  %v1668_v24 = vld [vmem:[%s2068_s2] sm:$0xff]  ;;  %v1471_v25 = vpack.i.bf16 %v1656_v22, %v1650_v21  ;;  %s1602_s9 = smov 96   ;;  %s1603_s10 = smov 112   ;;  %vm137_vm8 = vcmask 130048   ;;  %vm197_vm9 = vcmask 64512  }
   0x6   :  { %v1476_v26 = vpack.i.bf16 %v1668_v24, %v1662_v23  ;;  %v1491_v41 = vld [vmem:[%s2067_s1] ss:$0 sm:$0xff]  ;;  %v1492_v45 = vld [vmem:[%s2067_s1 + $0x1] ss:$0 sm:$0xff]  ;;  %v1690_v55 = vld [vmem:[%s2067_s1 + $0x6] ss:$0 sm:$0xff] }
   0x7   :  { %120 = vmatpush.msra.mxu0 %v1656_v22  ;;  %v1493_v57 = vld [vmem:[%s2067_s1 + $0x5] ss:$0 sm:$0xff]  ;;  %s1604_s13 = smov 64   ;;  %s1605_s14 = smov 32  }
   0x8   :  { %s1606_s15 = smov 48   ;;  %s1607_s5 = smov [#allocation2]  }
   0x9   :  { %121 = vmatpush.msra.mxu0 %v1662_v23  ;;  %s1399_s6 = sshll.u32 %s1607_s5, 4  ;;  %s1401_s12 = sshll.u32 %s2070_s4, 4  ;;  %s1400_s6 = int_to_ptr.vmem [resolvable:$true] %s1399_s6  ;;  %s1402_s12 = int_to_ptr.hbm [resolvable:$true] %s1401_s12 }
   0xb   :  { %27 = vadd.xlane.f32.xlu0 %v26_v3  ;;  %v1511_v5 = vpop.eup %1510  ;;  %122 = vmatpush.msra.mxu0 %v1668_v24 }
   0xc   :  { %v30_v6 = vmul.f32 32.0, %v1511_v5  ;;  %vm34_vm1 = vweird.f32 %v1511_v5 }
   0xe   :  { %v31_v7 = vsub.f32 1.0, %v30_v6 }
  0x10   :  { %v32_v8 = vmul.f32 %v1511_v5, %v31_v7 }
  0x12   :  { %v33_v9 = vadd.f32 %v1511_v5, %v32_v8 }
  0x14   :  { %v1641_v10 = vsel %vm34_vm1, %v1511_v5, %v33_v9 }
  0x76   :  { %v25_v11 = vpop.xlane.xlu0 %24 }
  0x77   :  { %v36_v12 = vmul.f32 %v1641_v10, %v25_v11 }
  0x79   :  { %v38_v13 = vsub.f32 %v18_v0, %v36_v12 }
  0x7b   :  { %v40_v14 = vmul.f32 %v38_v13, %v38_v13 }
  0x7d   :  { %v42_v15 = vsel %vm22_vm0, %v40_v14, 0.0 }
  0x7e   :  { %43 = vadd.xlane.f32.xlu1 %v42_v15  ;;  %v28_v16 = vpop.xlane.xlu0 %27 }
  0x7f   :  { %v37_v17 = vmul.f32 %v1641_v10, %v28_v16 }
  0x81   :  { %v39_v18 = vsub.f32 %v19_v2, %v37_v17  ;;  %v80_v2 = vld [vmem:[%s2067_s1 + $0x3] sm:$0x3] }
  0x82   :  { %v1718_v3 = vperm.slane %v80_v2, 0  ;;  %v82_v8 = vrot.slane %v80_v2, 1 }
  0x83   :  { %v41_v19 = vmul.f32 %v39_v18, %v39_v18 }
  0x84   :  { %v1722_v9 = vperm.slane %v82_v8, 0 }
  0x85   :  { %v45_v20 = vsel %vm22_vm0, %v41_v19, 0.0 }
  0x86   :  { %46 = vadd.xlane.f32.xlu1 %v45_v20 }
  0xf1   :  { %v44_v27 = vpop.xlane.xlu1 %43 }
  0xf2   :  { %v48_v28 = vmul.f32 %v44_v27, %v1641_v10 }
  0xf4   :  { %v50_v29 = vadd.f32 1e-12, %v48_v28 }
  0xf6   :  { %1512 = vrsqrt.f32 %v50_v29  ;;  %vm58_vm3 = vweird.f32 %v50_v29 }
  0xf9   :  { %v47_v30 = vpop.xlane.xlu1 %46 }
  0xfa   :  { %v49_v31 = vmul.f32 %v47_v30, %v1641_v10 }
  0xfc   :  { %v1513_v32 = vpop.eup %1512  ;;  %v51_v33 = vadd.f32 1e-12, %v49_v31 }
  0xfd   :  { %v53_v34 = vmul.f32 %v1513_v32, %v50_v29  ;;  %vm59_vm2 = vweird.f32 %v1513_v32 }
  0xfe   :  { %1514 = vrsqrt.f32 %v51_v33  ;;  %vm60_vm4 = vmor %vm58_vm3, %vm59_vm2  ;;  %vm68_vm5 = vweird.f32 %v51_v33 }
  0xff   :  { %v54_v35 = vmul.f32 %v1513_v32, %v53_v34 }
 0x101   :  { %v55_v36 = vmul.f32 0.5, %v54_v35 }
 0x103   :  { %v56_v37 = vsub.f32 1.5, %v55_v36 }
 0x104   :  { %v1515_v38 = vpop.eup %1514 }
 0x105   :  { %v57_v39 = vmul.f32 %v1513_v32, %v56_v37  ;;  %v63_v40 = vmul.f32 %v1515_v38, %v51_v33  ;;  %vm69_vm6 = vweird.f32 %v1515_v38 }
 0x106   :  { %vm70_vm7 = vmor %vm68_vm5, %vm69_vm6 }
 0x107   :  { %v61_v42 = vsel %vm60_vm4, %v1513_v32, %v57_v39  ;;  %v64_v43 = vmul.f32 %v1515_v38, %v63_v40 }
 0x108   :  { %v72_v44 = vmul.f32 %v61_v42, %v38_v13 }
 0x109   :  { %v65_v46 = vmul.f32 0.5, %v64_v43 }
 0x10a   :  { %v75_v47 = vmul.f32 %v1491_v41, %v72_v44 }
 0x10b   :  { %v66_v48 = vsub.f32 1.5, %v65_v46 }
 0x10c   :  { %v1683_v49 = vadd.f32 %v1492_v45, %v75_v47 }
 0x10d   :  { %v67_v50 = vmul.f32 %v1515_v38, %v66_v48 }
 0x10e   :  { %1410 = vmatmul.msk.f32.vlgmr.msra.gmra.mxu0 %vm22_vm0, %v1683_v49 }
 0x10f   :  { %v71_v51 = vsel %vm70_vm7, %v1515_v38, %v67_v50 }
 0x110   :  { %v73_v52 = vmul.f32 %v71_v51, %v39_v18 }
 0x112   :  { %v76_v53 = vmul.f32 %v1491_v41, %v73_v52 }
 0x114   :  { %v79_v54 = vadd.f32 %v1492_v45, %v76_v53 }
 0x116   :  { %1411 = vmatmul.msk.f32.gmra.mxu0 %vm22_vm0, %v79_v54  ;;  %v1694_v56 = vadd.f32 %v1690_v55, %v79_v54 }
 0x18b   :  { %v124_v58 = vpop.f32.mrf.mxu0 }
 0x18c   :  { %v1699_v59 = vadd.f32 %v1493_v57, %v124_v58 }
 0x18e   :  { %339 = vrot.lane.b32.xlu0 %v1699_v59, %s1601_s8  ;;  %135 = vrot.lane.b32.xlu2 %v1699_v59, %s1602_s9 }
 0x18f   :  { %337 = vrot.lane.b32.xlu1 %v1699_v59, %s1603_s10 }
 0x193   :  { %v127_v60 = vpop.f32.mrf.mxu0 }
 0x194   :  { %v128_v61 = vadd.f32 %v1493_v57, %v127_v60 }
 0x196   :  { %163 = vrot.lane.b32.xlu2 %v128_v61, %s1602_s9 }
 0x1e8   :  { %v136_v62 = vpop.permute.xlu2 %135 }
 0x1e9   :  { %1412 = vmatpush.xpose.msk.msra.mxu1 %vm137_vm8, %v136_v62 }
 0x1ec   :  { %1413 = vmatmul.msk.f32.vlgmr.msra.gmra.mxu1 %vm137_vm8, %v1699_v59 }
 0x1f0   :  { %v164_v63 = vpop.permute.xlu2 %163 }
 0x1f1   :  { %1414 = vmatpush.xpose.msk.msra.mxu2 %vm137_vm8, %v164_v63 }
 0x1f4   :  { %1415 = vmatmul.msk.f32.vlgmr.msra.gmra.mxu2 %vm137_vm8, %v128_v61 }
 0x200   :  { %v340_v0 = vpop.permute.xlu0 %339 }
 0x201   :  { %1420 = vmatpush.xpose.msk.msrb.mxu2 %vm137_vm8, %v340_v0  ;;  %v338_v1 = vpop.permute.xlu1 %337 }
 0x204   :  { %1421 = vmatmul.msk.f32.vlgmr.msrb.gmra.mxu2 %vm137_vm8, %v338_v1 }
 0x269   :  { %v159_v4 = vpop.f32.mrf.mxu1 }
 0x26a   :  { %v189_v5 = vmul.f32 0.25, %v159_v4 }
 0x26c   :  { %v195_v6 = vadd.f32 %v1718_v3, %v189_v5 }
 0x26e   :  { %v198_v7 = vsel %vm197_vm9, %v195_v6, -inf }
 0x26f   :  { %199 = vmax.xlane.f32.xlu2 %v198_v7 }
 0x277   :  { %v186_v11 = vpop.f32.mrf.mxu2 }
 0x278   :  { %v190_v12 = vmul.f32 0.25, %v186_v11 }
 0x27a   :  { %v196_v13 = vadd.f32 %v1722_v9, %v190_v12 }
 0x27c   :  { %v201_v14 = vsel %vm197_vm9, %v196_v13, -inf }
 0x27d   :  { %202 = vmax.xlane.f32.xlu0 %v201_v14 }
 0x287   :  { %272 = vrot.lane.b32.xlu2 %v128_v61, %s1604_s13  ;;  %v362_v15 = vpop.f32.mrf.mxu2 }
 0x288   :  { %v393_v16 = vmul.f32 0.25, %v362_v15 }
 0x28a   :  { %v395_v17 = vadd.f32 %v393_v16, %v1718_v3 }
 0x28c   :  { %v397_v18 = vsel %vm197_vm9, %v395_v17, -inf }
 0x28d   :  { %398 = vmax.xlane.f32.xlu1 %v397_v18 }
 0x291   :  { %246 = vrot.lane.b32.xlu0 %v1699_v59, %s1604_s13 }
 0x299   :  { %365 = vrot.lane.b32.xlu0 %v128_v61, %s1603_s10 }
 0x2a1   :  { %1472 = vrot.lane.b32.xlu0 %v1471_v25, %s1605_s14 }
 0x2a6   :  { %367 = vrot.lane.b32.xlu1 %v128_v61, %s1601_s8 }
 0x2ae   :  { %1477 = vrot.lane.b32.xlu1 %v1476_v26, %s1605_s14 }
 0x2b6   :  { %471 = vrot.lane.b32.xlu1 %v128_v61, %s1606_s15 }
 0x2e2   :  { %v200_v19 = vpop.xlane.xlu2 %199 }
 0x2e3   :  { %v204_v20 = vsub.f32 %v195_v6, %v200_v19 }
 0x2e5   :  { %v206_v27 = vmul.f32 1.442695, %v204_v20 }
 0x2e7   :  { %1516 = vpow2.f32 %v206_v27 }
 0x2ea   :  { %v273_v33 = vpop.permute.xlu2 %272 }
 0x2ed   :  { %v1517_v28 = vpop.eup %1516 }
 0x2ee   :  { %v210_v29 = vsel %vm197_vm9, %v1517_v28, 0.0 }
 0x2ef   :  { %211 = vadd.xlane.f32.xlu2 %v210_v29 }
 0x2f0   :  { %v203_v21 = vpop.xlane.xlu0 %202 }
 0x2f1   :  { %v205_v22 = vsub.f32 %v196_v13, %v203_v21 }
 0x2f3   :  { %v208_v25 = vmul.f32 1.442695, %v205_v22 }
 0x2f5   :  { %1518 = vpow2.f32 %v208_v25 }
 0x2fb   :  { %v1519_v30 = vpop.eup %1518 }
 0x2fc   :  { %v213_v31 = vsel %vm197_vm9, %v1519_v30, 0.0 }
 0x2fd   :  { %214 = vadd.xlane.f32.xlu2 %v213_v31 }
 0x300   :  { %v399_v23 = vpop.xlane.xlu1 %398 }
 0x301   :  { %v403_v24 = vsub.f32 %v395_v17, %v399_v23 }
 0x303   :  { %v405_v26 = vmul.f32 1.442695, %v403_v24  ;;  %v247_v32 = vpop.permute.xlu0 %246 }
 0x304   :  { %267 = vmatpush.msra.mxu3 %v247_v32 }
 0x305   :  { %1520 = vpow2.f32 %v405_v26 }
 0x306   :  { %293 = vmatpush.msrb.mxu3 %v273_v33 }
 0x30b   :  { %v1744_v34 = vpop.eup %1520  ;;  %v366_v12 = vpop.permute.xlu0 %365 }
 0x30c   :  { %v409_v35 = vsel %vm197_vm9, %v1744_v34, 0.0 }
 0x30d   :  { %410 = vadd.xlane.f32.xlu2 %v409_v35 }
 0x313   :  { %v1473_v27 = vpop.permute.xlu0 %1472 }
 0x314   :  { %v1474_v29 = vunpack.i.l.bf16 %v1473_v27 }
 0x318   :  { %v368_v36 = vpop.permute.xlu1 %367 }
 0x320   :  { %v1748_v37 = vpop.permute.xlu1 %1477 }
 0x321   :  { %v1479_v53 = vunpack.i.l.bf16 %v1748_v37  ;;  %v1480_v20 = vunpack.i.h.bf16 %v1748_v37  ;;  %v132_v37 = vadd.f32 %v1690_v55, %v1683_v49 }
 0x323   :  { %326 = vmatpush.msrb.mxu1 %v1479_v53 }
 0x325   :  { %445 = vrot.lane.b32.xlu2 %v1699_v59, %s1606_s15  ;;  %327 = vmatpush.msrb.mxu1 %v1480_v20  ;;  %v97_v20 = vld [vmem:[%s2069_s3 + $0x30] sm:$0xff] }
 0x328   :  { %v472_v38 = vpop.permute.xlu1 %471 }
 0x329   :  { %492 = vmatpush.msrb.mxu0 %v472_v38 }
 0x362   :  { %v212_v39 = vpop.xlane.xlu2 %211 }
 0x363   :  { %1522 = vrcp.f32 %v212_v39  ;;  %v227_v43 = vand.u32 2147483648, %v212_v39  ;;  %v225_v45 = vand.u32 2147483647, %v212_v39  ;;  %vm221_vm11 = vweird.f32 %v212_v39 }
 0x365   :  { %v228_v48 = vor.u32 1.1754944e-38, %v227_v43  ;;  %vm226_vm13 = vcmp.eq.f32.partialorder %v225_v45, 8.507059e+37 }
 0x369   :  { %v1523_v40 = vpop.eup %1522 }
 0x36a   :  { %v217_v41 = vmul.f32 %v1523_v40, %v212_v39  ;;  %vm222_vm10 = vweird.f32 %v1523_v40 }
 0x36b   :  { %vm223_vm12 = vmor %vm221_vm11, %vm222_vm10 }
 0x36c   :  { %v218_v42 = vsub.f32 1.0, %v217_v41 }
 0x36e   :  { %v219_v44 = vmul.f32 %v1523_v40, %v218_v42 }
 0x370   :  { %v215_v46 = vpop.xlane.xlu2 %214  ;;  %v220_v47 = vadd.f32 %v1523_v40, %v219_v44 }
 0x371   :  { %1524 = vrcp.f32 %v215_v46  ;;  %v241_v60 = vand.u32 2147483648, %v215_v46  ;;  %v239_v61 = vand.u32 2147483647, %v215_v46  ;;  %vm235_vm15 = vweird.f32 %v215_v46 }
 0x372   :  { %v224_v50 = vsel %vm223_vm12, %v1523_v40, %v220_v47 }
 0x373   :  { %v229_v51 = vsel %vm226_vm13, %v228_v48, %v224_v50  ;;  %v242_v63 = vor.u32 1.1754944e-38, %v241_v60  ;;  %vm240_vm2 = vcmp.eq.f32.partialorder %v239_v61, 8.507059e+37  ;;  %v90_v60 = vld [vmem:[%s2068_s2 + $0x38] sm:$0xff]  ;;  %v88_v61 = vld [vmem:[%s2068_s2 + $0x28] sm:$0xff] }
 0x374   :  { %v244_v52 = vmul.f32 %v1517_v28, %v229_v51  ;;  %v1475_v28 = vunpack.i.h.bf16 %v1473_v27  ;;  %608 = vmatpush.msra.mxu1 %v90_v60  ;;  %v96_v27 = vld [vmem:[%s2069_s3 + $0x28] sm:$0xff] }
 0x376   :  { %1416 = vmatmul.msk.f32.vlgmr.msra.gmra.mxu3 %vm197_vm9, %v244_v52  ;;  %609 = vmatpush.msra.mxu1 %v88_v61 }
 0x377   :  { %v1525_v54 = vpop.eup %1524  ;;  %1422 = vmatpush.xpose.msk.msra.mxu3 %vm137_vm8, %v368_v36 }
 0x378   :  { %v231_v57 = vmul.f32 %v1525_v54, %v215_v46  ;;  %vm236_vm14 = vweird.f32 %v1525_v54 }
 0x379   :  { %vm237_vm1 = vmor %vm235_vm15, %vm236_vm14 }
 0x37a   :  { %v232_v58 = vsub.f32 1.0, %v231_v57 }
 0x37c   :  { %v233_v59 = vmul.f32 %v1525_v54, %v232_v58 }
 0x37e   :  { %v234_v62 = vadd.f32 %v1525_v54, %v233_v59 }
 0x380   :  { %v411_v0 = vpop.xlane.xlu2 %410  ;;  %v238_v1 = vsel %vm237_vm1, %v1525_v54, %v234_v62  ;;  %v86_v62 = vld [vmem:[%s2068_s2 + $0x18] sm:$0xff]  ;;  %vm639_vm1 = vcmask 523264  }
 0x381   :  { %1526 = vrcp.f32 %v411_v0  ;;  %v243_v2 = vsel %vm240_vm2, %v242_v63, %v238_v1  ;;  %v426_v11 = vand.u32 2147483648, %v411_v0  ;;  %v424_v14 = vand.u32 2147483647, %v411_v0  ;;  %v84_v63 = vld [vmem:[%s2068_s2 + $0x8] sm:$0xff]  ;;  %610 = vmatpush.msra.mxu1 %v86_v62 }
 0x382   :  { %v245_v4 = vmul.f32 %v1519_v30, %v243_v2  ;;  %vm420_vm4 = vweird.f32 %v411_v0 }
 0x383   :  { %v427_v16 = vor.u32 1.1754944e-38, %v426_v11  ;;  %vm425_vm6 = vcmp.eq.f32.partialorder %v424_v14, 8.507059e+37  ;;  %611 = vmatpush.msra.mxu1 %v84_v63 }
 0x384   :  { %1417 = vmatmul.msk.f32.vlgmr.msrb.gmra.mxu3 %vm197_vm9, %v245_v4 }
 0x385   :  { %525 = vmatpush.msrb.mxu3 %v1474_v29  ;;  %v94_v29 = vld [vmem:[%s2069_s3 + $0x18] sm:$0xff] }
 0x387   :  { %v1527_v5 = vpop.eup %1526  ;;  %526 = vmatpush.msrb.mxu3 %v1475_v28  ;;  %v95_v28 = vld [vmem:[%s2069_s3 + $0x20] sm:$0xff] }
 0x388   :  { %v416_v6 = vmul.f32 %v1527_v5, %v411_v0  ;;  %v446_v7 = vpop.permute.xlu2 %445  ;;  %vm421_vm3 = vweird.f32 %v1527_v5 }
 0x389   :  { %466 = vmatpush.msra.mxu2 %v446_v7  ;;  %vm422_vm5 = vmor %vm420_vm4, %vm421_vm3 }
 0x38a   :  { %v417_v8 = vsub.f32 1.0, %v416_v6 }
 0x38c   :  { %v418_v13 = vmul.f32 %v1527_v5, %v417_v8  ;;  %1423 = vmatmul.msk.f32.vlgmr.msra.gmra.mxu3 %vm137_vm8, %v366_v12 }
 0x38e   :  { %v419_v15 = vadd.f32 %v1527_v5, %v418_v13  ;;  %v1789_v13 = vld [vmem:[%s2067_s1 + $0x7] ss:$0 sm:$0xff] }
 0x390   :  { %v423_v17 = vsel %vm422_vm5, %v1527_v5, %v419_v15 }
 0x391   :  { %v428_v18 = vsel %vm425_vm6, %v427_v16, %v423_v17  ;;  %v1794_v16 = vld [vmem:[%s2067_s1 + $0x8] ss:$0 sm:$0xff] }
 0x392   :  { %v443_v19 = vmul.f32 %v1744_v34, %v428_v18 }
 0x394   :  { %1424 = vmatmul.msk.f32.vlgmr.msra.gmra.mxu2 %vm197_vm9, %v443_v19  ;;  %v98_v19 = vld [vmem:[%s2069_s3 + $0x38] sm:$0xff] }
 0x395   :  { %654 = vmatpush.msrb.mxu2 %v98_v19  ;;  %v1866_v19 = vld [vmem:[%s2068_s2 + $0x40] sm:$0xff] }
 0x397   :  { %655 = vmatpush.msrb.mxu2 %v97_v20 }
 0x399   :  { %656 = vmatpush.msrb.mxu2 %v96_v27 }
 0x39b   :  { %657 = vmatpush.msrb.mxu2 %v95_v28 }
 0x39d   :  { %658 = vmatpush.msrb.mxu2 %v94_v29 }
 0x3f9   :  { %v269_v21 = vpop.f32.mrf.mxu3 }
 0x3fa   :  { %1418 = vmatmul.msk.f32.vlgmr.msrb.gmra.mxu1 %vm137_vm8, %v269_v21  ;;  %v93_v21 = vld [vmem:[%s2069_s3 + $0x10] sm:$0xff] }
 0x3fb   :  { %659 = vmatpush.msrb.mxu2 %v93_v21 }
 0x407   :  { %v295_v22 = vpop.f32.mrf.mxu3 }
 0x408   :  { %1419 = vmatmul.msk.f32.gmra.mxu1 %vm137_vm8, %v295_v22 }
 0x40f   :  { %v390_v25 = vpop.f32.mrf.mxu3 }
 0x410   :  { %v394_v30 = vmul.f32 0.25, %v390_v25  ;;  %v92_v25 = vld [vmem:[%s2069_s3 + $0x8] sm:$0xff] }
 0x411   :  { %660 = vmatpush.msrb.mxu2 %v92_v25 }
 0x412   :  { %v396_v31 = vadd.f32 %v394_v30, %v1722_v9  ;;  %v91_v30 = vld [vmem:[%s2069_s3] sm:$0xff] }
 0x413   :  { %661 = vmatpush.msrb.mxu2 %v91_v30 }
 0x414   :  { %v400_v23 = vsel %vm197_vm9, %v396_v31, -inf }
 0x415   :  { %401 = vmax.xlane.f32.xlu2 %v400_v23 }
 0x417   :  { %v468_v24 = vpop.f32.mrf.mxu2 }
 0x418   :  { %1426 = vmatmul.msk.f32.vlgmr.msrb.gmra.mxu3 %vm137_vm8, %v468_v24 }
 0x477   :  { %v329_v36 = vpop.f32.mrf.mxu1 }
 0x478   :  { %v335_v38 = vadd.f32 %v329_v36, %v132_v37 }
 0x485   :  { %v332_v22 = vpop.f32.mrf.mxu1 }
 0x488   :  { %v402_v26 = vpop.xlane.xlu2 %401 }
 0x489   :  { %v404_v32 = vsub.f32 %v396_v31, %v402_v26  ;;  %v336_v31 = vadd.f32 %v332_v22, %v1694_v56 }
 0x48b   :  { %v407_v33 = vmul.f32 1.442695, %v404_v32  ;;  %v1497_v32 = vld [vmem:[%s2067_s1 + $0x9] ss:$0 sm:$0xff] }
 0x48d   :  { %1528 = vpow2.f32 %v407_v33 }
 0x493   :  { %v1529_v34 = vpop.eup %1528 }
 0x494   :  { %v412_v35 = vsel %vm197_vm9, %v1529_v34, 0.0 }
 0x495   :  { %413 = vadd.xlane.f32.xlu0 %v412_v35 }
 0x49b   :  { %v528_v39 = vpop.f32.mrf.mxu3 }
 0x49c   :  { %v534_v40 = vadd.f32 %v528_v39, %v335_v38 }
 0x49e   :  { %v538_v41 = vsel %vm22_vm0, %v534_v40, 0.0 }
 0x49f   :  { %539 = vadd.xlane.f32.xlu1 %v538_v41 }
 0x508   :  { %v414_v42 = vpop.xlane.xlu0 %413 }
 0x509   :  { %1530 = vrcp.f32 %v414_v42  ;;  %v440_v48 = vand.u32 2147483648, %v414_v42  ;;  %v438_v51 = vand.u32 2147483647, %v414_v42  ;;  %vm434_vm10 = vweird.f32 %v414_v42 }
 0x50b   :  { %v441_v53 = vor.u32 1.1754944e-38, %v440_v48  ;;  %vm439_vm12 = vcmp.eq.f32.partialorder %v438_v51, 8.507059e+37  ;;  %v1834_v48 = vld [vmem:[%s2067_s1 + $0xa] ss:$0 sm:$0xff] }
 0x50f   :  { %v1531_v43 = vpop.eup %1530 }
 0x510   :  { %v430_v44 = vmul.f32 %v1531_v43, %v414_v42  ;;  %vm435_vm7 = vweird.f32 %v1531_v43 }
 0x511   :  { %vm436_vm11 = vmor %vm434_vm10, %vm435_vm7 }
 0x512   :  { %v540_v45 = vpop.xlane.xlu1 %539  ;;  %v431_v46 = vsub.f32 1.0, %v430_v44 }
 0x513   :  { %v544_v47 = vmul.f32 %v540_v45, %v1641_v10 }
 0x514   :  { %v432_v50 = vmul.f32 %v1531_v43, %v431_v46 }
 0x515   :  { %v546_v52 = vsub.f32 %v534_v40, %v544_v47 }
 0x516   :  { %v433_v49 = vadd.f32 %v1531_v43, %v432_v50 }
 0x517   :  { %v548_v55 = vmul.f32 %v546_v52, %v546_v52 }
 0x518   :  { %v437_v57 = vsel %vm436_vm11, %v1531_v43, %v433_v49 }
 0x519   :  { %v550_v54 = vsel %vm22_vm0, %v548_v55, 0.0  ;;  %v442_v58 = vsel %vm439_vm12, %v441_v53, %v437_v57 }
 0x51a   :  { %551 = vadd.xlane.f32.xlu2 %v550_v54  ;;  %v444_v59 = vmul.f32 %v1529_v34, %v442_v58 }
 0x51c   :  { %1425 = vmatmul.msk.f32.vlgmr.msrb.gmra.mxu0 %vm197_vm9, %v444_v59 }
 0x58d   :  { %v552_v0 = vpop.xlane.xlu2 %551 }
 0x58e   :  { %v556_v1 = vmul.f32 %v552_v0, %v1641_v10 }
 0x590   :  { %v558_v2 = vadd.f32 1e-12, %v556_v1 }
 0x592   :  { %1532 = vrsqrt.f32 %v558_v2  ;;  %vm566_vm14 = vweird.f32 %v558_v2 }
 0x598   :  { %v1533_v4 = vpop.eup %1532 }
 0x599   :  { %v561_v5 = vmul.f32 %v1533_v4, %v558_v2  ;;  %v494_v6 = vpop.f32.mrf.mxu0  ;;  %vm567_vm13 = vweird.f32 %v1533_v4 }
 0x59a   :  { %1427 = vmatmul.msk.f32.gmra.mxu3 %vm137_vm8, %v494_v6  ;;  %vm568_vm15 = vmor %vm566_vm14, %vm567_vm13 }
 0x59b   :  { %v562_v7 = vmul.f32 %v1533_v4, %v561_v5 }
 0x59d   :  { %v563_v8 = vmul.f32 0.5, %v562_v7 }
 0x59f   :  { %v564_v11 = vsub.f32 1.5, %v563_v8 }
 0x5a1   :  { %v565_v12 = vmul.f32 %v1533_v4, %v564_v11 }
 0x5a3   :  { %v569_v14 = vsel %vm568_vm15, %v1533_v4, %v565_v12 }
 0x5a4   :  { %v580_v15 = vmul.f32 %v569_v14, %v546_v52  ;;  %v1847_v14 = vld [vmem:[%s2068_s2 + $0x70] sm:$0xff] }
 0x5a5   :  { %760 = vmatpush.msra.mxu0 %v1847_v14 }
 0x5a6   :  { %v583_v17 = vmul.f32 %v1789_v13, %v580_v15  ;;  %v1853_v15 = vld [vmem:[%s2068_s2 + $0x60] sm:$0xff] }
 0x5a7   :  { %761 = vmatpush.msra.mxu0 %v1853_v15 }
 0x5a8   :  { %v586_v18 = vadd.f32 %v1794_v16, %v583_v17  ;;  %v1486_v17 = vpack.i.bf16 %v1853_v15, %v1847_v14 }
 0x5aa   :  { %1428 = vmatmul.msk.f32.vlgmr.msra.gmra.mxu1 %vm22_vm0, %v586_v18 }
 0x61d   :  { %v531_v23 = vpop.f32.mrf.mxu3 }
 0x61e   :  { %v535_v24 = vadd.f32 %v531_v23, %v336_v31 }
 0x620   :  { %v541_v26 = vsel %vm22_vm0, %v535_v24, 0.0 }
 0x621   :  { %542 = vadd.xlane.f32.xlu0 %v541_v26 }
 0x627   :  { %v613_v33 = vpop.f32.mrf.mxu1 }
 0x628   :  { %v614_v34 = vadd.f32 %v1497_v32, %v613_v33 }
 0x62a   :  { %v621_v35 = vmul.f32 0.044715, %v614_v34  ;;  %v619_v40 = vmul.f32 0.5, %v614_v34 }
 0x62c   :  { %v623_v36 = vmul.f32 %v621_v35, %v614_v34 }
 0x62e   :  { %v625_v37 = vmul.f32 %v623_v36, %v614_v34 }
 0x630   :  { %v627_v38 = vadd.f32 %v625_v37, %v614_v34  ;;  %v1499_v37 = vld [vmem:[%s2067_s1 + $0xb] ss:$0 sm:$0xff] }
 0x632   :  { %v629_v39 = vmul.f32 0.7978846, %v627_v38 }
 0x634   :  { %1534 = vtanh.f32 %v629_v39 }
 0x63a   :  { %v1535_v56 = vpop.eup %1534 }
 0x63b   :  { %v633_v41 = vadd.f32 1.0, %v1535_v56  ;;  %v1500_v56 = vld [vmem:[%s2067_s1 + $0xc] ss:$0 sm:$0xff] }
 0x63d   :  { %v635_v42 = vmul.f32 %v633_v41, %v619_v40 }
 0x63f   :  { %1430 = vmatmul.msk.f32.vlgmr.msrb.gmra.mxu2 %vm639_vm1, %v635_v42 }
 0x694   :  { %v543_v43 = vpop.xlane.xlu0 %542 }
 0x695   :  { %v545_v44 = vmul.f32 %v543_v43, %v1641_v10 }
 0x697   :  { %v547_v45 = vsub.f32 %v535_v24, %v545_v44 }
 0x699   :  { %v549_v46 = vmul.f32 %v547_v45, %v547_v45 }
 0x69b   :  { %v553_v47 = vsel %vm22_vm0, %v549_v46, 0.0  ;;  %v1501_v46 = vld [vmem:[%s2067_s1 + $0xd] ss:$0 sm:$0xff] }
 0x69c   :  { %554 = vadd.xlane.f32.xlu2 %v553_v47 }
 0x6c2   :  { %v663_v50 = vpop.f32.mrf.mxu2 }
 0x6c3   :  { %v664_v51 = vadd.f32 %v1834_v48, %v663_v50 }
 0x6c5   :  { %v669_v52 = vadd.f32 %v664_v51, %v586_v18  ;;  %v1861_v18 = vld [vmem:[%s2068_s2 + $0x50] sm:$0xff] }
 0x6c6   :  { %v1481_v20 = vpack.i.bf16 %v1866_v19, %v1861_v18  ;;  %762 = vmatpush.msra.mxu0 %v1861_v18 }
 0x6c7   :  { %v673_v49 = vsel %vm22_vm0, %v669_v52, 0.0 }
 0x6c8   :  { %674 = vadd.xlane.f32.xlu0 %v673_v49  ;;  %763 = vmatpush.msra.mxu0 %v1866_v19 }
 0x70f   :  { %v555_v55 = vpop.xlane.xlu2 %554 }
 0x710   :  { %v557_v53 = vmul.f32 %v555_v55, %v1641_v10 }
 0x712   :  { %v559_v54 = vadd.f32 1e-12, %v557_v53 }
 0x714   :  { %1536 = vrsqrt.f32 %v559_v54  ;;  %vm576_vm3 = vweird.f32 %v559_v54 }
 0x71a   :  { %v1537_v57 = vpop.eup %1536 }
 0x71b   :  { %v571_v58 = vmul.f32 %v1537_v57, %v559_v54  ;;  %vm577_vm2 = vweird.f32 %v1537_v57 }
 0x71c   :  { %vm578_vm4 = vmor %vm576_vm3, %vm577_vm2 }
 0x71d   :  { %v572_v59 = vmul.f32 %v1537_v57, %v571_v58 }
 0x71f   :  { %v573_v60 = vmul.f32 0.5, %v572_v59 }
 0x721   :  { %v574_v61 = vsub.f32 1.5, %v573_v60 }
 0x723   :  { %v575_v62 = vmul.f32 %v1537_v57, %v574_v61 }
 0x725   :  { %v579_v63 = vsel %vm578_vm4, %v1537_v57, %v575_v62 }
 0x726   :  { %v581_v0 = vmul.f32 %v579_v63, %v547_v45 }
 0x728   :  { %v584_v1 = vmul.f32 %v1789_v13, %v581_v0 }
 0x72a   :  { %v587_v2 = vadd.f32 %v1794_v16, %v584_v1 }
 0x72c   :  { %1429 = vmatmul.msk.f32.gmra.mxu1 %vm22_vm0, %v587_v2 }
 0x73b   :  { %v675_v4 = vpop.xlane.xlu0 %674 }
 0x73c   :  { %v679_v5 = vmul.f32 %v675_v4, %v1641_v10 }
 0x73e   :  { %v681_v6 = vsub.f32 %v669_v52, %v679_v5 }
 0x740   :  { %v683_v7 = vmul.f32 %v681_v6, %v681_v6 }
 0x742   :  { %v685_v8 = vsel %vm22_vm0, %v683_v7, 0.0 }
 0x743   :  { %686 = vadd.xlane.f32.xlu1 %v685_v8 }
 0x7a9   :  { %v616_v11 = vpop.f32.mrf.mxu1 }
 0x7aa   :  { %v617_v12 = vadd.f32 %v1497_v32, %v616_v11 }
 0x7ac   :  { %v622_v13 = vmul.f32 0.044715, %v617_v12  ;;  %v620_v31 = vmul.f32 0.5, %v617_v12 }
 0x7ae   :  { %v624_v16 = vmul.f32 %v622_v13, %v617_v12 }
 0x7b0   :  { %v626_v27 = vmul.f32 %v624_v16, %v617_v12 }
 0x7b2   :  { %v628_v28 = vadd.f32 %v626_v27, %v617_v12 }
 0x7b4   :  { %v630_v29 = vmul.f32 0.7978846, %v628_v28 }
 0x7b6   :  { %v687_v21 = vpop.xlane.xlu1 %686  ;;  %1538 = vtanh.f32 %v630_v29 }
 0x7b7   :  { %v691_v22 = vmul.f32 %v687_v21, %v1641_v10 }
 0x7b9   :  { %v693_v25 = vadd.f32 1e-12, %v691_v22 }
 0x7bb   :  { %1540 = vrsqrt.f32 %v693_v25  ;;  %vm701_vm6 = vweird.f32 %v693_v25 }
 0x7bc   :  { %v1539_v30 = vpop.eup %1538 }
 0x7bd   :  { %v634_v23 = vadd.f32 1.0, %v1539_v30 }
 0x7bf   :  { %v636_v24 = vmul.f32 %v634_v23, %v620_v31 }
 0x7c1   :  { %v1541_v26 = vpop.eup %1540  ;;  %1431 = vmatmul.msk.f32.gmra.mxu2 %vm639_vm1, %v636_v24 }
 0x7c2   :  { %v696_v32 = vmul.f32 %v1541_v26, %v693_v25  ;;  %vm702_vm5 = vweird.f32 %v1541_v26 }
 0x7c3   :  { %vm703_vm7 = vmor %vm701_vm6, %vm702_vm5 }
 0x7c4   :  { %v697_v33 = vmul.f32 %v1541_v26, %v696_v32 }
 0x7c6   :  { %v698_v34 = vmul.f32 0.5, %v697_v33 }
 0x7c8   :  { %v699_v35 = vsub.f32 1.5, %v698_v34 }
 0x7ca   :  { %v700_v36 = vmul.f32 %v1541_v26, %v699_v35 }
 0x7cc   :  { %v704_v38 = vsel %vm703_vm7, %v1541_v26, %v700_v36 }
 0x7cd   :  { %v715_v39 = vmul.f32 %v704_v38, %v681_v6 }
 0x7cf   :  { %v718_v40 = vmul.f32 %v1499_v37, %v715_v39 }
 0x7d1   :  { %v1880_v41 = vadd.f32 %v1500_v56, %v718_v40 }
 0x7d3   :  { %1440 = vmatmul.msk.f32.vlgmr.msra.gmra.mxu0 %vm22_vm0, %v1880_v41 }
 0x844   :  { %v666_v42 = vpop.f32.mrf.mxu2 }
 0x845   :  { %v667_v43 = vadd.f32 %v1834_v48, %v666_v42 }
 0x847   :  { %v670_v44 = vadd.f32 %v667_v43, %v587_v2 }
 0x849   :  { %v676_v45 = vsel %vm22_vm0, %v670_v44, 0.0 }
 0x84a   :  { %677 = vadd.xlane.f32.xlu2 %v676_v45 }
 0x850   :  { %v765_v47 = vpop.f32.mrf.mxu0 }
 0x851   :  { %v1889_v50 = vadd.f32 %v1501_v46, %v765_v47 }
 0x853   :  { %776 = vrot.lane.b32.xlu0 %v1889_v50, %s1602_s9 }
 0x85b   :  { %972 = vrot.lane.b32.xlu0 %v1889_v50, %s1603_s10 }
 0x863   :  { %881 = vrot.lane.b32.xlu0 %v1889_v50, %s1604_s13 }
 0x8bd   :  { %v678_v48 = vpop.xlane.xlu2 %677 }
 0x8be   :  { %v680_v51 = vmul.f32 %v678_v48, %v1641_v10 }
 0x8c0   :  { %v682_v52 = vsub.f32 %v670_v44, %v680_v51 }
 0x8c2   :  { %v684_v49 = vmul.f32 %v682_v52, %v682_v52 }
 0x8c4   :  { %v688_v55 = vsel %vm22_vm0, %v684_v49, 0.0 }
 0x8c5   :  { %v777_v53 = vpop.permute.xlu0 %776  ;;  %689 = vadd.xlane.f32.xlu1 %v688_v55 }
 0x8c6   :  { %1442 = vmatpush.xpose.msk.msra.mxu3 %vm137_vm8, %v777_v53 }
 0x8c9   :  { %1443 = vmatmul.msk.f32.vlgmr.msra.gmra.mxu3 %vm137_vm8, %v1889_v50 }
 0x8cd   :  { %v1902_v54 = vpop.permute.xlu0 %972 }
 0x8d5   :  { %v882_v57 = vpop.permute.xlu0 %881 }
 0x8d6   :  { %902 = vmatpush.msrb.mxu0 %v882_v57 }
 0x938   :  { %v690_v58 = vpop.xlane.xlu1 %689 }
 0x939   :  { %v692_v59 = vmul.f32 %v690_v58, %v1641_v10 }
 0x93b   :  { %v694_v60 = vadd.f32 1e-12, %v692_v59 }
 0x93d   :  { %1542 = vrsqrt.f32 %v694_v60  ;;  %vm711_vm11 = vweird.f32 %v694_v60 }
 0x943   :  { %v1543_v61 = vpop.eup %1542 }
 0x944   :  { %v706_v62 = vmul.f32 %v1543_v61, %v694_v60  ;;  %vm712_vm10 = vweird.f32 %v1543_v61 }
 0x945   :  { %vm713_vm12 = vmor %vm711_vm11, %vm712_vm10 }
 0x946   :  { %v707_v63 = vmul.f32 %v1543_v61, %v706_v62 }
 0x948   :  { %v708_v0 = vmul.f32 0.5, %v707_v63 }
 0x94a   :  { %v709_v1 = vsub.f32 1.5, %v708_v0 }
 0x94c   :  { %v799_v2 = vpop.f32.mrf.mxu3  ;;  %v710_v4 = vmul.f32 %v1543_v61, %v709_v1 }
 0x94d   :  { %v829_v5 = vmul.f32 0.25, %v799_v2 }
 0x94e   :  { %v714_v6 = vsel %vm713_vm12, %v1543_v61, %v710_v4 }
 0x94f   :  { %v831_v7 = vadd.f32 %v829_v5, %v1718_v3  ;;  %v716_v8 = vmul.f32 %v714_v6, %v682_v52 }
 0x951   :  { %v833_v11 = vsel %vm197_vm9, %v831_v7, -inf  ;;  %v719_v12 = vmul.f32 %v1499_v37, %v716_v8 }
 0x952   :  { %834 = vmax.xlane.f32.xlu2 %v833_v11 }
 0x953   :  { %v1907_v13 = vadd.f32 %v1500_v56, %v719_v12 }
 0x955   :  { %1441 = vmatmul.msk.f32.gmra.mxu0 %vm22_vm0, %v1907_v13 }
 0x9c5   :  { %v835_v16 = vpop.xlane.xlu2 %834 }
 0x9c6   :  { %v839_v27 = vsub.f32 %v831_v7, %v835_v16 }
 0x9c8   :  { %v841_v28 = vmul.f32 1.442695, %v839_v27 }
 0x9ca   :  { %1544 = vpow2.f32 %v841_v28 }
 0x9d0   :  { %v1545_v29 = vpop.eup %1544 }
 0x9d1   :  { %v845_v21 = vsel %vm197_vm9, %v1545_v29, 0.0 }
 0x9d2   :  { %846 = vadd.xlane.f32.xlu1 %v845_v21  ;;  %v768_v22 = vpop.f32.mrf.mxu0 }
 0x9d3   :  { %v1912_v25 = vadd.f32 %v1501_v46, %v768_v22 }
 0x9d5   :  { %1002 = vrot.lane.b32.xlu0 %v1912_v25, %s1601_s8  ;;  %803 = vrot.lane.b32.xlu2 %v1912_v25, %s1602_s9 }
 0x9dd   :  { %1000 = vrot.lane.b32.xlu2 %v1912_v25, %s1603_s10 }
 0x9eb   :  { %974 = vrot.lane.b32.xlu1 %v1889_v50, %s1601_s8 }
 0xa2f   :  { %v804_v30 = vpop.permute.xlu2 %803 }
 0xa30   :  { %1444 = vmatpush.xpose.msk.msrb.mxu1 %vm137_vm8, %v804_v30 }
 0xa33   :  { %1445 = vmatmul.msk.f32.vlgmr.msrb.gmra.mxu1 %vm137_vm8, %v1912_v25 }
 0xa37   :  { %v1001_v42 = vpop.permute.xlu2 %1000 }
 0xa45   :  { %v847_v31 = vpop.xlane.xlu1 %846 }
 0xa46   :  { %1546 = vrcp.f32 %v847_v31  ;;  %v862_v33 = vand.u32 2147483648, %v847_v31  ;;  %v860_v35 = vand.u32 2147483647, %v847_v31  ;;  %vm856_vm14 = vweird.f32 %v847_v31 }
 0xa47   :  { %v1003_v23 = vpop.permute.xlu0 %1002 }
 0xa48   :  { %1452 = vmatpush.xpose.msk.msra.mxu0 %vm137_vm8, %v1003_v23  ;;  %v863_v37 = vor.u32 1.1754944e-38, %v862_v33  ;;  %vm861_vm2 = vcmp.eq.f32.partialorder %v860_v35, 8.507059e+37 }
 0xa4c   :  { %v1547_v24 = vpop.eup %1546 }
 0xa4d   :  { %v852_v26 = vmul.f32 %v1547_v24, %v847_v31  ;;  %vm857_vm13 = vweird.f32 %v1547_v24 }
 0xa4e   :  { %vm858_vm15 = vmor %vm856_vm14, %vm857_vm13 }
 0xa4f   :  { %v853_v32 = vsub.f32 1.0, %v852_v26 }
 0xa51   :  { %v854_v34 = vmul.f32 %v1547_v24, %v853_v32 }
 0xa53   :  { %v855_v36 = vadd.f32 %v1547_v24, %v854_v34 }
 0xa55   :  { %v859_v38 = vsel %vm858_vm15, %v1547_v24, %v855_v36 }
 0xa56   :  { %v864_v39 = vsel %vm861_vm2, %v863_v37, %v859_v38 }
 0xa57   :  { %v879_v56 = vmul.f32 %v1545_v29, %v864_v39 }
 0xa59   :  { %1446 = vmatmul.msk.f32.vlgmr.msrb.gmra.mxu0 %vm197_vm9, %v879_v56 }
 0xa5d   :  { %v975_v40 = vpop.permute.xlu1 %974 }
 0xa5e   :  { %1450 = vmatpush.xpose.msk.msra.mxu2 %vm137_vm8, %v975_v40 }
 0xa61   :  { %1451 = vmatmul.msk.f32.vlgmr.msra.gmra.mxu2 %vm137_vm8, %v1902_v54  ;;  %1453 = vmatmul.msk.f32.vlgmr.msra.gmra.mxu0 %vm137_vm8, %v1001_v42 }
 0xab0   :  { %v826_v43 = vpop.f32.mrf.mxu1 }
 0xab1   :  { %v830_v44 = vmul.f32 0.25, %v826_v43 }
 0xab3   :  { %v832_v45 = vadd.f32 %v830_v44, %v1722_v9 }
 0xab5   :  { %v836_v46 = vsel %vm197_vm9, %v832_v45, -inf }
 0xab6   :  { %837 = vmax.xlane.f32.xlu1 %v836_v46 }
 0xad6   :  { %v1933_v47 = vpop.f32.mrf.mxu0 }
 0xade   :  { %v1025_v48 = vpop.f32.mrf.mxu0 }
 0xadf   :  { %v1029_v51 = vmul.f32 0.25, %v1025_v48 }
 0xae1   :  { %v1031_v52 = vadd.f32 %v1029_v51, %v1722_v9 }
 0xae3   :  { %v1035_v49 = vsel %vm197_vm9, %v1031_v52, -inf }
 0xae4   :  { %1036 = vmax.xlane.f32.xlu2 %v1035_v49  ;;  %v997_v55 = vpop.f32.mrf.mxu2 }
 0xae5   :  { %v1028_v53 = vmul.f32 0.25, %v997_v55 }
 0xae7   :  { %v1030_v54 = vadd.f32 %v1028_v53, %v1718_v3 }
 0xae9   :  { %v1032_v57 = vsel %vm197_vm9, %v1030_v54, -inf }
 0xaea   :  { %1033 = vmax.xlane.f32.xlu0 %v1032_v57 }
 0xb29   :  { %v838_v58 = vpop.xlane.xlu1 %837 }
 0xb2a   :  { %v840_v59 = vsub.f32 %v832_v45, %v838_v58 }
 0xb2c   :  { %v843_v60 = vmul.f32 1.442695, %v840_v59 }
 0xb2e   :  { %1548 = vpow2.f32 %v843_v60 }
 0xb34   :  { %v1549_v61 = vpop.eup %1548 }
 0xb35   :  { %v848_v62 = vsel %vm197_vm9, %v1549_v61, 0.0 }
 0xb36   :  { %849 = vadd.xlane.f32.xlu1 %v848_v62 }
 0xb4f   :  { %907 = vrot.lane.b32.xlu1 %v1912_v25, %s1604_s13 }
 0xb57   :  { %v1037_v9 = vpop.xlane.xlu2 %1036  ;;  %1487 = vrot.lane.b32.xlu1 %v1486_v17, %s1605_s14 }
 0xb58   :  { %v1039_v63 = vsub.f32 %v1031_v52, %v1037_v9 }
 0xb5a   :  { %v1042_v3 = vmul.f32 1.442695, %v1039_v63 }
 0xb5c   :  { %1550 = vpow2.f32 %v1042_v3 }
 0xb5d   :  { %v1034_v0 = vpop.xlane.xlu0 %1033 }
 0xb5e   :  { %v1038_v1 = vsub.f32 %v1030_v54, %v1034_v0 }
 0xb60   :  { %v1040_v2 = vmul.f32 1.442695, %v1038_v1 }
 0xb62   :  { %v1551_v4 = vpop.eup %1550  ;;  %1552 = vpow2.f32 %v1040_v2 }
 0xb63   :  { %v1047_v5 = vsel %vm197_vm9, %v1551_v4, 0.0 }
 0xb64   :  { %1048 = vadd.xlane.f32.xlu2 %v1047_v5 }
 0xb68   :  { %v1947_v6 = vpop.eup %1552 }
 0xb69   :  { %v1044_v7 = vsel %vm197_vm9, %v1947_v6, 0.0 }
 0xb6a   :  { %1045 = vadd.xlane.f32.xlu0 %v1044_v7 }
 0xb7c   :  { %1106 = vrot.lane.b32.xlu2 %v1912_v25, %s1606_s15 }
 0xb7e   :  { %1080 = vrot.lane.b32.xlu0 %v1889_v50, %s1606_s15 }
 0xb86   :  { %1482 = vrot.lane.b32.xlu0 %v1481_v20, %s1605_s14 }
 0xba9   :  { %v850_v14 = vpop.xlane.xlu1 %849 }
 0xbaa   :  { %1554 = vrcp.f32 %v850_v14  ;;  %v876_v16 = vand.u32 2147483648, %v850_v14  ;;  %vm870_vm4 = vweird.f32 %v850_v14  ;;  %v874_v27 = vand.u32 2147483647, %v850_v14 }
 0xbac   :  { %v877_v29 = vor.u32 1.1754944e-38, %v876_v16  ;;  %vm875_vm6 = vcmp.eq.f32.partialorder %v874_v27, 8.507059e+37 }
 0xbb0   :  { %v1555_v15 = vpop.eup %1554 }
 0xbb1   :  { %v866_v17 = vmul.f32 %v1555_v15, %v850_v14  ;;  %vm871_vm3 = vweird.f32 %v1555_v15 }
 0xbb2   :  { %vm872_vm5 = vmor %vm870_vm4, %vm871_vm3 }
 0xbb3   :  { %v867_v8 = vsub.f32 1.0, %v866_v17 }
 0xbb5   :  { %v868_v11 = vmul.f32 %v1555_v15, %v867_v8 }
 0xbb7   :  { %v869_v12 = vadd.f32 %v1555_v15, %v868_v11 }
 0xbb9   :  { %v873_v28 = vsel %vm872_vm5, %v1555_v15, %v869_v12 }
 0xbba   :  { %v878_v50 = vsel %vm875_vm6, %v877_v29, %v873_v28  ;;  %v1439_v28 = vld [vmem:[%s2068_s2 + $0x78] sm:$0xff]  ;;  %v1437_v29 = vld [vmem:[%s2068_s2 + $0x68] sm:$0xff] }
 0xbbb   :  { %v880_v22 = vmul.f32 %v1549_v61, %v878_v50  ;;  %v1502_v61 = vld [vmem:[%s2067_s1 + $0xe] ss:$0 sm:$0xff]  ;;  %v1435_v50 = vld [vmem:[%s2068_s2 + $0x58] sm:$0xff] }
 0xbbc   :  { %v774_v2 = vadd.f32 %v1502_v61, %v1907_v13 }
 0xbc1   :  { %v908_v21 = vpop.permute.xlu1 %907 }
 0xbc2   :  { %928 = vmatpush.msrb.mxu3 %v908_v21  ;;  %v1433_v21 = vld [vmem:[%s2068_s2 + $0x48] sm:$0xff] }
 0xbc3   :  { %1447 = vmatmul.msk.f32.vlgmr.msrb.gmra.mxu3 %vm197_vm9, %v880_v22 }
 0xbc9   :  { %v1488_v54 = vpop.permute.xlu1 %1487 }
 0xbca   :  { %v1490_v57 = vunpack.i.h.bf16 %v1488_v54  ;;  %v1489_v58 = vunpack.i.l.bf16 %v1488_v54  ;;  %v736_v54 = vld [vmem:[%s2069_s3 + $0x60] sm:$0xff] }
 0xbcc   :  { %1160 = vmatpush.msrb.mxu0 %v1489_v58  ;;  %v734_v58 = vld [vmem:[%s2069_s3 + $0x50] sm:$0xff] }
 0xbce   :  { %1161 = vmatpush.msrb.mxu0 %v1490_v57  ;;  %v735_v57 = vld [vmem:[%s2069_s3 + $0x58] sm:$0xff] }
 0xbd7   :  { %v1049_v18 = vpop.xlane.xlu2 %1048 }
 0xbd8   :  { %1556 = vrcp.f32 %v1049_v18  ;;  %v1075_v23 = vand.u32 2147483648, %v1049_v18  ;;  %v1073_v26 = vand.u32 2147483647, %v1049_v18  ;;  %vm1069_vm10 = vweird.f32 %v1049_v18 }
 0xbda   :  { %v1076_v35 = vor.u32 1.1754944e-38, %v1075_v23  ;;  %vm1074_vm12 = vcmp.eq.f32.partialorder %v1073_v26, 8.507059e+37 }
 0xbdd   :  { %v1046_v19 = vpop.xlane.xlu0 %1045 }
 0xbde   :  { %v1557_v20 = vpop.eup %1556  ;;  %1558 = vrcp.f32 %v1046_v19  ;;  %v1061_v39 = vand.u32 2147483648, %v1046_v19  ;;  %v1059_v40 = vand.u32 2147483647, %v1046_v19  ;;  %vm1055_vm14 = vweird.f32 %v1046_v19 }
 0xbdf   :  { %v1065_v25 = vmul.f32 %v1557_v20, %v1049_v18  ;;  %v1107_v30 = vpop.permute.xlu2 %1106  ;;  %vm1070_vm7 = vweird.f32 %v1557_v20 }
 0xbe0   :  { %1127 = vmatpush.msrb.mxu2 %v1107_v30  ;;  %vm1071_vm11 = vmor %vm1069_vm10, %vm1070_vm7  ;;  %v1062_v44 = vor.u32 1.1754944e-38, %v1061_v39  ;;  %vm1060_vm2 = vcmp.eq.f32.partialorder %v1059_v40, 8.507059e+37 }
 0xbe1   :  { %v1066_v31 = vsub.f32 1.0, %v1065_v25 }
 0xbe3   :  { %v1067_v24 = vmul.f32 %v1557_v20, %v1066_v31 }
 0xbe4   :  { %v1559_v32 = vpop.eup %1558 }
 0xbe5   :  { %v1068_v33 = vadd.f32 %v1557_v20, %v1067_v24  ;;  %v1051_v34 = vmul.f32 %v1559_v32, %v1046_v19  ;;  %vm1056_vm13 = vweird.f32 %v1559_v32 }
 0xbe6   :  { %vm1057_vm15 = vmor %vm1055_vm14, %vm1056_vm13  ;;  %vm1364_vm14 = vcmask 1040384  }
 0xbe7   :  { %v1072_v36 = vsel %vm1071_vm11, %v1557_v20, %v1068_v33  ;;  %v1052_v37 = vsub.f32 1.0, %v1051_v34 }
 0xbe8   :  { %v1077_v38 = vsel %vm1074_vm12, %v1076_v35, %v1072_v36  ;;  %v1503_v36 = vld [vmem:[%s2067_s1 + $0xf] ss:$0 sm:$0xff] }
 0xbe9   :  { %v1053_v56 = vmul.f32 %v1559_v32, %v1052_v37  ;;  %v1079_v42 = vmul.f32 %v1551_v4, %v1077_v38 }
 0xbeb   :  { %v1054_v43 = vadd.f32 %v1559_v32, %v1053_v56  ;;  %1455 = vmatmul.msk.f32.vlgmr.msrb.gmra.mxu2 %vm197_vm9, %v1079_v42  ;;  %v1504_v56 = vld [vmem:[%s2067_s1 + $0x10] ss:$0 sm:$0xff] }
 0xbed   :  { %v1058_v45 = vsel %vm1057_vm15, %v1559_v32, %v1054_v43  ;;  %vm1392_vm15 = vcmask 254976  }
 0xbee   :  { %v1063_v46 = vsel %vm1060_vm2, %v1062_v44, %v1058_v45 }
 0xbef   :  { %v1078_v48 = vmul.f32 %v1947_v6, %v1063_v46 }
 0xbf0   :  { %v1081_v51 = vpop.permute.xlu0 %1080 }
 0xbf1   :  { %1101 = vmatpush.msra.mxu3 %v1081_v51 }
 0xbf2   :  { %1454 = vmatmul.msk.f32.vlgmr.msra.gmra.mxu3 %vm197_vm9, %v1078_v48 }
 0xbf3   :  { %1243 = vmatpush.msrb.mxu3 %v1439_v28  ;;  %v1506_v28 = vld [vmem:[%s2067_s1 + $0x12] ss:$0 sm:$0xff] }
 0xbf5   :  { %1244 = vmatpush.msrb.mxu3 %v1437_v29 }
 0xbf7   :  { %1245 = vmatpush.msrb.mxu3 %v1435_v50 }
 0xbf8   :  { %v1483_v52 = vpop.permute.xlu0 %1482 }
 0xbf9   :  { %v1485_v49 = vunpack.i.h.bf16 %v1483_v52  ;;  %v1484_v55 = vunpack.i.l.bf16 %v1483_v52  ;;  %1246 = vmatpush.msrb.mxu3 %v1433_v21 }
 0xbfb   :  { %961 = vmatpush.msra.mxu1 %v1484_v55  ;;  %v738_v55 = vld [vmem:[%s2069_s3 + $0x70] sm:$0xff] }
 0xbfd   :  { %962 = vmatpush.msra.mxu1 %v1485_v49  ;;  %v739_v49 = vld [vmem:[%s2069_s3 + $0x78] sm:$0xff] }
 0xbfe   :  { %1448 = vmatmul.msk.f32.vlgmr.msra.gmra.mxu1 %vm137_vm8, %v1933_v47  ;;  %v773_v47 = vadd.f32 %v1502_v61, %v1880_v41  ;;  %v1505_v61 = vld [vmem:[%s2067_s1 + $0x11] ss:$0 sm:$0xff] }
 0xbff   :  { %1288 = vmatpush.msrb.mxu1 %v739_v49 }
 0xc01   :  { %1289 = vmatpush.msrb.mxu1 %v738_v55 }
 0xc46   :  { %v930_v53 = vpop.f32.mrf.mxu3 }
 0xc47   :  { %1449 = vmatmul.msk.f32.gmra.mxu1 %vm137_vm8, %v930_v53  ;;  %v737_v53 = vld [vmem:[%s2069_s3 + $0x68] sm:$0xff] }
 0xc48   :  { %1290 = vmatpush.msrb.mxu1 %v737_v53 }
 0xc4a   :  { %1291 = vmatpush.msrb.mxu1 %v736_v54 }
 0xc4c   :  { %1292 = vmatpush.msrb.mxu1 %v735_v57 }
 0xc4e   :  { %1293 = vmatpush.msrb.mxu1 %v734_v58 }
 0xc6e   :  { %v1129_v60 = vpop.f32.mrf.mxu2 }
 0xc75   :  { %v1103_v59 = vpop.f32.mrf.mxu3 }
 0xc76   :  { %1456 = vmatmul.msk.f32.vlgmr.msrb.gmra.mxu0 %vm137_vm8, %v1103_v59  ;;  %v733_v59 = vld [vmem:[%s2069_s3 + $0x48] sm:$0xff] }
 0xc77   :  { %1294 = vmatpush.msrb.mxu1 %v733_v59 }
 0xc7b   :  { %v964_v62 = vpop.f32.mrf.mxu1 }
 0xc7c   :  { %v970_v9 = vadd.f32 %v964_v62, %v773_v47 }
 0xc7e   :  { %1457 = vmatmul.msk.f32.gmra.mxu0 %vm137_vm8, %v1129_v60  ;;  %v732_v60 = vld [vmem:[%s2069_s3 + $0x40] sm:$0xff] }
 0xc7f   :  { %1295 = vmatpush.msrb.mxu1 %v732_v60 }
 0xcc4   :  { %v967_v1 = vpop.f32.mrf.mxu1 }
 0xcc5   :  { %v971_v4 = vadd.f32 %v967_v1, %v774_v2 }
 0xcf3   :  { %v1163_v63 = vpop.f32.mrf.mxu0 }
 0xcf4   :  { %v1169_v3 = vadd.f32 %v1163_v63, %v970_v9 }
 0xcf6   :  { %v1173_v0 = vsel %vm22_vm0, %v1169_v3, 0.0 }
 0xcf7   :  { %1174 = vadd.xlane.f32.xlu2 %v1173_v0 }
 0xcfb   :  { %v1166_v5 = vpop.f32.mrf.mxu0 }
 0xcfc   :  { %v1170_v6 = vadd.f32 %v1166_v5, %v971_v4 }
 0xcfe   :  { %v1176_v7 = vsel %vm22_vm0, %v1170_v6, 0.0 }
 0xcff   :  { %1177 = vadd.xlane.f32.xlu0 %v1176_v7 }
 0xd6a   :  { %v1175_v14 = vpop.xlane.xlu2 %1174 }
 0xd6b   :  { %v1179_v15 = vmul.f32 %v1175_v14, %v1641_v10 }
 0xd6d   :  { %v1181_v17 = vsub.f32 %v1169_v3, %v1179_v15 }
 0xd6f   :  { %v1183_v41 = vmul.f32 %v1181_v17, %v1181_v17 }
 0xd71   :  { %v1185_v8 = vsel %vm22_vm0, %v1183_v41, 0.0 }
 0xd72   :  { %1186 = vadd.xlane.f32.xlu1 %v1185_v8  ;;  %v1178_v11 = vpop.xlane.xlu0 %1177 }
 0xd73   :  { %v1180_v12 = vmul.f32 %v1178_v11, %v1641_v10 }
 0xd75   :  { %v1182_v16 = vsub.f32 %v1170_v6, %v1180_v12 }
 0xd77   :  { %v1184_v27 = vmul.f32 %v1182_v16, %v1182_v16 }
 0xd79   :  { %v1188_v13 = vsel %vm22_vm0, %v1184_v27, 0.0 }
 0xd7a   :  { %1189 = vadd.xlane.f32.xlu2 %v1188_v13 }
 0xde5   :  { %v1187_v22 = vpop.xlane.xlu1 %1186 }
 0xde6   :  { %v1191_v18 = vmul.f32 %v1187_v22, %v1641_v10 }
 0xde8   :  { %v1193_v19 = vadd.f32 1e-12, %v1191_v18 }
 0xdea   :  { %1560 = vrsqrt.f32 %v1193_v19  ;;  %vm1201_vm9 = vweird.f32 %v1193_v19 }
 0xded   :  { %v1190_v20 = vpop.xlane.xlu2 %1189 }
 0xdee   :  { %v1192_v25 = vmul.f32 %v1190_v20, %v1641_v10 }
 0xdf0   :  { %v1561_v30 = vpop.eup %1560  ;;  %v1194_v31 = vadd.f32 1e-12, %v1192_v25 }
 0xdf1   :  { %v1196_v23 = vmul.f32 %v1561_v30, %v1193_v19  ;;  %vm1202_vm8 = vweird.f32 %v1561_v30 }
 0xdf2   :  { %1562 = vrsqrt.f32 %v1194_v31  ;;  %vm1203_vm3 = vmor %vm1201_vm9, %vm1202_vm8  ;;  %vm1211_vm5 = vweird.f32 %v1194_v31 }
 0xdf3   :  { %v1197_v24 = vmul.f32 %v1561_v30, %v1196_v23 }
 0xdf5   :  { %v1198_v26 = vmul.f32 0.5, %v1197_v24 }
 0xdf7   :  { %v1199_v32 = vsub.f32 1.5, %v1198_v26 }
 0xdf8   :  { %v1563_v33 = vpop.eup %1562 }
 0xdf9   :  { %v1200_v34 = vmul.f32 %v1561_v30, %v1199_v32  ;;  %v1206_v35 = vmul.f32 %v1563_v33, %v1194_v31  ;;  %vm1212_vm4 = vweird.f32 %v1563_v33 }
 0xdfa   :  { %vm1213_vm6 = vmor %vm1211_vm5, %vm1212_vm4 }
 0xdfb   :  { %v1204_v37 = vsel %vm1203_vm3, %v1561_v30, %v1200_v34  ;;  %v1207_v38 = vmul.f32 %v1563_v33, %v1206_v35 }
 0xdfc   :  { %v1215_v39 = vmul.f32 %v1204_v37, %v1181_v17 }
 0xdfd   :  { %v1208_v40 = vmul.f32 0.5, %v1207_v38 }
 0xdfe   :  { %v1218_v42 = vmul.f32 %v1503_v36, %v1215_v39  ;;  %v1360_v39 = vld [vmem:[%s2069_s3 + $0x98] sm:$0xff] }
 0xdff   :  { %v1209_v43 = vsub.f32 1.5, %v1208_v40  ;;  %1383 = vmatpush.msra.mxu2 %v1360_v39 }
 0xe00   :  { %v1221_v44 = vadd.f32 %v1504_v56, %v1218_v42  ;;  %v1358_v42 = vld [vmem:[%s2069_s3 + $0x88] sm:$0xff] }
 0xe01   :  { %v1210_v45 = vmul.f32 %v1563_v33, %v1209_v43  ;;  %v1357_v43 = vld [vmem:[%s2069_s3 + $0x80] sm:$0xff] }
 0xe02   :  { %1458 = vmatmul.msk.f32.vlgmr.msrb.gmra.mxu3 %vm22_vm0, %v1221_v44 }
 0xe03   :  { %v1214_v46 = vsel %vm1213_vm6, %v1563_v33, %v1210_v45 }
 0xe04   :  { %v1216_v48 = vmul.f32 %v1214_v46, %v1182_v16 }
 0xe06   :  { %v1219_v51 = vmul.f32 %v1503_v36, %v1216_v48 }
 0xe08   :  { %v1222_v52 = vadd.f32 %v1504_v56, %v1219_v51  ;;  %v1359_v56 = vld [vmem:[%s2069_s3 + $0x90] sm:$0xff] }
 0xe09   :  { %1384 = vmatpush.msra.mxu2 %v1359_v56 }
 0xe0a   :  { %1459 = vmatmul.msk.f32.gmra.mxu3 %vm22_vm0, %v1222_v52 }
 0xe0b   :  { %1385 = vmatpush.msra.mxu2 %v1358_v42 }
 0xe0d   :  { %1386 = vmatpush.msra.mxu2 %v1357_v43 }
 0xe85   :  { %v1248_v62 = vpop.f32.mrf.mxu3 }
 0xe86   :  { %v1249_v47 = vadd.f32 %v1505_v61, %v1248_v62 }
 0xe88   :  { %v1256_v9 = vmul.f32 0.044715, %v1249_v47  ;;  %v1254_v41 = vmul.f32 0.5, %v1249_v47 }
 0xe8a   :  { %v1258_v63 = vmul.f32 %v1256_v9, %v1249_v47 }
 0xe8c   :  { %v1260_v3 = vmul.f32 %v1258_v63, %v1249_v47 }
 0xe8d   :  { %v1251_v0 = vpop.f32.mrf.mxu3 }
 0xe8e   :  { %v1262_v1 = vadd.f32 %v1260_v3, %v1249_v47  ;;  %v1252_v2 = vadd.f32 %v1505_v61, %v1251_v0 }
 0xe90   :  { %v1264_v4 = vmul.f32 0.7978846, %v1262_v1  ;;  %v1257_v5 = vmul.f32 0.044715, %v1252_v2  ;;  %v1255_v16 = vmul.f32 0.5, %v1252_v2 }
 0xe91   :  { %v1508_v1 = vld [vmem:[%s2067_s1 + $0x14] ss:$0 sm:$0xff] }
 0xe92   :  { %1564 = vtanh.f32 %v1264_v4  ;;  %v1259_v6 = vmul.f32 %v1257_v5, %v1252_v2 }
 0xe94   :  { %v1261_v7 = vmul.f32 %v1259_v6, %v1252_v2 }
 0xe96   :  { %v1263_v14 = vadd.f32 %v1261_v7, %v1252_v2  ;;  %v1509_v7 = vld [vmem:[%s2067_s1 + $0x2] ss:$0 sm:$0xff] }
 0xe98   :  { %v1565_v15 = vpop.eup %1564  ;;  %v1265_v17 = vmul.f32 0.7978846, %v1263_v14 }
 0xe99   :  { %v1268_v8 = vadd.f32 1.0, %v1565_v15 }
 0xe9a   :  { %1566 = vtanh.f32 %v1265_v17 }
 0xe9b   :  { %v1270_v11 = vmul.f32 %v1268_v8, %v1254_v41 }
 0xe9d   :  { %1460 = vmatmul.msk.f32.vlgmr.msrb.gmra.mxu1 %vm639_vm1, %v1270_v11 }
 0xea0   :  { %v1567_v12 = vpop.eup %1566 }
 0xea1   :  { %v1269_v27 = vadd.f32 1.0, %v1567_v12 }
 0xea3   :  { %v1271_v13 = vmul.f32 %v1269_v27, %v1255_v16 }
 0xea5   :  { %1461 = vmatmul.msk.f32.gmra.mxu1 %vm639_vm1, %v1271_v13 }
 0xf1a   :  { %v1297_v29 = vpop.f32.mrf.mxu1 }
 0xf1b   :  { %v1298_v50 = vadd.f32 %v1506_v28, %v1297_v29 }
 0xf1d   :  { %v1303_v21 = vadd.f32 %v1298_v50, %v1221_v44 }
 0xf1f   :  { %v1307_v22 = vsel %vm22_vm0, %v1303_v21, 0.0 }
 0xf20   :  { %1308 = vadd.xlane.f32.xlu1 %v1307_v22 }
 0xf22   :  { %v1300_v18 = vpop.f32.mrf.mxu1 }
 0xf23   :  { %v1301_v19 = vadd.f32 %v1506_v28, %v1300_v18 }
 0xf25   :  { %v1304_v20 = vadd.f32 %v1301_v19, %v1222_v52 }
 0xf27   :  { %v1310_v25 = vsel %vm22_vm0, %v1304_v20, 0.0 }
 0xf28   :  { %1311 = vadd.xlane.f32.xlu0 %v1310_v25 }
 0xf93   :  { %v1309_v30 = vpop.xlane.xlu1 %1308 }
 0xf94   :  { %v1313_v31 = vmul.f32 %v1309_v30, %v1641_v10 }
 0xf96   :  { %v1315_v23 = vsub.f32 %v1303_v21, %v1313_v31 }
 0xf98   :  { %v1317_v24 = vmul.f32 %v1315_v23, %v1315_v23 }
 0xf9a   :  { %v1319_v26 = vsel %vm22_vm0, %v1317_v24, 0.0 }
 0xf9b   :  { %1320 = vadd.xlane.f32.xlu0 %v1319_v26  ;;  %v1312_v32 = vpop.xlane.xlu0 %1311 }
 0xf9c   :  { %v1314_v33 = vmul.f32 %v1312_v32, %v1641_v10 }
 0xf9e   :  { %v1316_v34 = vsub.f32 %v1304_v20, %v1314_v33 }
 0xfa0   :  { %v1318_v35 = vmul.f32 %v1316_v34, %v1316_v34 }
 0xfa2   :  { %v1322_v36 = vsel %vm22_vm0, %v1318_v35, 0.0 }
 0xfa3   :  { %1323 = vadd.xlane.f32.xlu2 %v1322_v36 }
0x100e   :  { %v1321_v37 = vpop.xlane.xlu0 %1320 }
0x100f   :  { %v1325_v38 = vmul.f32 %v1321_v37, %v1641_v10 }
0x1011   :  { %v1327_v40 = vadd.f32 1e-12, %v1325_v38 }
0x1013   :  { %1568 = vrsqrt.f32 %v1327_v40  ;;  %vm1335_vm7 = vweird.f32 %v1327_v40 }
0x1016   :  { %v1324_v44 = vpop.xlane.xlu2 %1323 }
0x1017   :  { %v1326_v45 = vmul.f32 %v1324_v44, %v1641_v10  ;;  %v1507_v10 = vld [vmem:[%s2067_s1 + $0x13] ss:$0 sm:$0xff] }
0x1019   :  { %v1569_v46 = vpop.eup %1568  ;;  %v1328_v48 = vadd.f32 1e-12, %v1326_v45 }
0x101a   :  { %v1330_v51 = vmul.f32 %v1569_v46, %v1327_v40  ;;  %vm1336_vm1 = vweird.f32 %v1569_v46 }
0x101b   :  { %1570 = vrsqrt.f32 %v1328_v48  ;;  %vm1337_vm10 = vmor %vm1335_vm7, %vm1336_vm1  ;;  %vm1345_vm12 = vweird.f32 %v1328_v48 }
0x101c   :  { %v1331_v52 = vmul.f32 %v1569_v46, %v1330_v51 }
0x101e   :  { %v1332_v49 = vmul.f32 0.5, %v1331_v52 }
0x1020   :  { %v1333_v55 = vsub.f32 1.5, %v1332_v49 }
0x1021   :  { %v1571_v53 = vpop.eup %1570 }
0x1022   :  { %v1340_v54 = vmul.f32 %v1571_v53, %v1328_v48  ;;  %v1334_v57 = vmul.f32 %v1569_v46, %v1333_v55  ;;  %vm1346_vm11 = vweird.f32 %v1571_v53 }
0x1023   :  { %vm1347_vm13 = vmor %vm1345_vm12, %vm1346_vm11 }
0x1024   :  { %v1341_v58 = vmul.f32 %v1571_v53, %v1340_v54  ;;  %v1338_v60 = vsel %vm1337_vm10, %v1569_v46, %v1334_v57 }
0x1025   :  { %v1349_v47 = vmul.f32 %v1338_v60, %v1315_v23 }
0x1026   :  { %v1342_v59 = vmul.f32 0.5, %v1341_v58 }
0x1027   :  { %v1352_v3 = vmul.f32 %v1507_v10, %v1349_v47 }
0x1028   :  { %v1343_v61 = vsub.f32 1.5, %v1342_v59 }
0x1029   :  { %v1355_v4 = vadd.f32 %v1508_v1, %v1352_v3 }
0x102a   :  { %v1344_v62 = vmul.f32 %v1571_v53, %v1343_v61 }
0x102c   :  { %v1348_v9 = vsel %vm1347_vm13, %v1571_v53, %v1344_v62 }
0x102d   :  { %v1350_v63 = vmul.f32 %v1348_v9, %v1316_v34 }
0x102f   :  { %v1353_v0 = vmul.f32 %v1507_v10, %v1350_v63 }
0x1031   :  { %v1356_v2 = vadd.f32 %v1508_v1, %v1353_v0 }
0x1033   :  { %v1362_v5 = vrot.slane %v1356_v2, 7 }
0x1035   :  { %v1365_v6 = vsel %vm1364_vm14, %v1355_v4, %v1362_v5 }
0x1036   :  { %1462 = vmatmul.msk.f32.vlgmr.msra.gmra.mxu2 %vm22_vm0, %v1365_v6 }
0x10b9   :  { %v1388_v14 = vpop.f32.mrf.mxu2 }
0x10ba   :  { %v1389_v15 = vadd.f32 %v1509_v7, %v1388_v14 }
0x10bc   :  { %1572 = vtanh.f32 %v1389_v15 }
0x10c2   :  { %v1573_v17 = vpop.eup %1572 }
0x10c3   :  { %1393 = vst.msk [vmem:[#allocation2] sm:$0x3] %vm1392_vm15, %v1573_v17 }
0x10c4   :  { %1404 = dma.vmem_to_hbm [thread:$0]  %s1400_s6, 32, %s1402_s12, [#allocation3]  }
0x10c5   :  { %1598 = dma.done.wait [#allocation3], 32  }
0x10c6   :  { %1599 = vsyncadd [#allocation3], 4294967264 }
0x10c7   :  { %1409 = vsyncpa [#allocation3], 1 }

</bundles_post_ra>
